<compile_context>
chip_gen: v7x
topology: tpu7x:2x2x1
jax: 0.10.0
libtpu: 0.0.40
codegen_flags: <defaults>
</compile_context>

<pallas_src>
import functools

import jax
import jax.numpy as jnp
from jax import lax
from jax.experimental import pallas as pl
from jax.experimental.pallas import tpu as pltpu

EPS = 1e-5
HP = jax.lax.Precision.HIGHEST   # reference only


# ----------------------------- Pallas kernel -------------------------------
def _db_head_kernel(x_ref, w3_ref, b3_ref, wd1_ref, bd1_ref, wd2_ref, bd2_ref,
                    out_ref, *, H, W, C):
    # im2col: 9 shifted (H, W, C) views -> one (H*W, 9*C) LHS, single MXU matmul.
    patches = [
        x_ref[0, dy:dy + H, dx:dx + W, :].reshape(H * W, C)
        for dy in range(3) for dx in range(3)
    ]
    lhs = jnp.concatenate(patches, axis=-1).astype(jnp.bfloat16)      # (HW, 9C)

    # Conv3x3 + folded BN1 + ReLU, both branches fused along output channels.
    h1 = jnp.dot(lhs, w3_ref[...], preferred_element_type=jnp.float32)
    h1 = jnp.maximum(h1 + b3_ref[...], 0.0)                           # (HW, 2*C4)

    # ConvT(2,2) + folded BN2 + ReLU: all 4 (a,b) sub-pixels of both branches in
    # one dot (block-diagonal weight across branches).
    z = jnp.dot(h1.astype(jnp.bfloat16), wd1_ref[...],
                preferred_element_type=jnp.float32)
    z = jnp.maximum(z + bd1_ref[...], 0.0)                            # (HW, 8*C4)

    # Second ConvT(2,2): block-diagonal over (branch, a, b) -> 32 logit columns
    # indexed by r*16 + a*8 + b*4 + c*2 + d.
    logits = jnp.dot(z.astype(jnp.bfloat16), wd2_ref[...],
                     preferred_element_type=jnp.float32) + bd2_ref[...]  # (HW, 32)

    # Lane-dense store: transpose so lanes = H*W (multiple of 128), then sigmoid
    # via EUP exp + EUP approx reciprocal.
    logits_t = jnp.transpose(logits)                                  # (32, HW)
    out_ref[0] = pl.reciprocal(1.0 + jnp.exp(-logits_t), approx=True)


# ------------------------------- wrapper ------------------------------------
def _block_diag(a, b):
    ra, ca = a.shape
    rb, cb = b.shape
    top = jnp.concatenate([a, jnp.zeros((ra, cb), a.dtype)], axis=1)
    bot = jnp.concatenate([jnp.zeros((rb, ca), b.dtype), b], axis=1)
    return jnp.concatenate([top, bot], axis=0)


def db_head_forward(x_nchw, params):
    """x_nchw: (N, C, H, W) float32  ->  (N, 2, 4H, 4W) float32."""
    N, C, H, W = x_nchw.shape
    C4 = C // 4
    x = jnp.transpose(x_nchw, (0, 2, 3, 1)).astype(jnp.float32)       # NHWC
    xpad = jnp.pad(x, ((0, 0), (1, 1), (1, 1), (0, 0)))               # pad=1
    Hp, Wp = H + 2, W + 2

    def fold_branch(p):
        # fold eval-mode BN into conv / deconv weights+biases, pack for fused dots
        s1 = p["bn1_gamma"] / jnp.sqrt(p["bn1_var"] + EPS)
        w3 = (jnp.transpose(p["w3"], (2, 3, 1, 0)) * s1).reshape(9 * C, C4)
        b3 = p["bn1_beta"] - p["bn1_mean"] * s1                       # (C4,)
        s2 = p["bn2_gamma"] / jnp.sqrt(p["bn2_var"] + EPS)
        wd1 = jnp.transpose(p["wd1"], (2, 3, 0, 1)) * s2              # (a,b,ci,co)
        wd1 = jnp.transpose(wd1, (2, 0, 1, 3)).reshape(C4, 4 * C4)    # col=(a*2+b)*C4+co
        bd1 = jnp.tile((p["bd1"] - p["bn2_mean"]) * s2 + p["bn2_beta"], 4)  # (4*C4,)
        wd2_small = p["wd2"][:, 0].reshape(C4, 4)                     # (C4,4)  c*2+d
        wd2 = jnp.kron(jnp.eye(4, dtype=jnp.float32), wd2_small)      # (4*C4,16)
        bd2 = jnp.tile(p["bd2"], 16)                                  # (16,)
        return w3, b3, wd1, bd1, wd2, bd2

    fb = fold_branch(params["binarize"])
    ft = fold_branch(params["thresh"])

    W3 = jnp.concatenate([fb[0], ft[0]], axis=1).astype(jnp.bfloat16)   # (9C, 2C4)
    B3 = jnp.concatenate([fb[1], ft[1]])[None, :]                       # (1, 2C4)
    WD1 = _block_diag(fb[2], ft[2]).astype(jnp.bfloat16)                # (2C4, 8C4)
    BD1 = jnp.concatenate([fb[3], ft[3]])[None, :]                      # (1, 8C4)
    WD2 = _block_diag(fb[4], ft[4]).astype(jnp.bfloat16)                # (8C4, 32)
    BD2 = jnp.concatenate([fb[5], ft[5]])[None, :]                      # (1, 32)

    out = pl.pallas_call(
        functools.partial(_db_head_kernel, H=H, W=W, C=C),
        out_shape=jax.ShapeDtypeStruct((N, 32, H * W), jnp.float32),
        grid_spec=pltpu.PrefetchScalarGridSpec(
            num_scalar_prefetch=0,
            grid=(N,),
            in_specs=[
                pl.BlockSpec((1, Hp, Wp, C), lambda n: (n, 0, 0, 0)),
                pl.BlockSpec((9 * C, 2 * C4), lambda n: (0, 0)),
                pl.BlockSpec((1, 2 * C4), lambda n: (0, 0)),
                pl.BlockSpec((2 * C4, 8 * C4), lambda n: (0, 0)),
                pl.BlockSpec((1, 8 * C4), lambda n: (0, 0)),
                pl.BlockSpec((8 * C4, 32), lambda n: (0, 0)),
                pl.BlockSpec((1, 32), lambda n: (0, 0)),
            ],
            out_specs=pl.BlockSpec((1, 32, H * W), lambda n: (n, 0, 0)),
        ),
        compiler_params=pltpu.CompilerParams(
            dimension_semantics=("parallel",)),
    )(xpad, W3, B3, WD1, BD1, WD2, BD2)

    # pixel shuffle (glue): column index = r*16 + a*8 + b*4 + c*2 + d,
    # final pixel (r, 4h+2a+c, 4w+2b+d).
    y = out.reshape(N, 2, 2, 2, 2, 2, H, W)            # (n, r, a, b, c, d, h, w)
    y = jnp.transpose(y, (0, 1, 6, 2, 4, 7, 3, 5))     # (n, r, h, a, c, w, b, d)
    return y.reshape(N, 2, 4 * H, 4 * W)


# ------------------------- deterministic parameters --------------------------
def init_params(key, C):
    C4 = C // 4

    def branch(k):
        ks = jax.random.split(k, 12)

        def kaiming(kk, shape, fan_in):
            return jax.random.normal(kk, shape, jnp.float32) * jnp.sqrt(2.0 / fan_in)

        return dict(
            w3=kaiming(ks[0], (C4, C, 3, 3), C * 9),              # conv (O,I,3,3), no bias
            bn1_gamma=1.0 + 0.1 * jax.random.normal(ks[1], (C4,), jnp.float32),
            bn1_beta=0.1 * jax.random.normal(ks[2], (C4,), jnp.float32),
            bn1_mean=0.1 * jax.random.normal(ks[3], (C4,), jnp.float32),
            bn1_var=jax.random.uniform(ks[4], (C4,), jnp.float32, 0.5, 1.5),
            wd1=kaiming(ks[5], (C4, C4, 2, 2), C4 * 4),           # ConvT (I,O,2,2)
            bd1=0.1 * jax.random.normal(ks[6], (C4,), jnp.float32),
            bn2_gamma=1.0 + 0.1 * jax.random.normal(ks[7], (C4,), jnp.float32),
            bn2_beta=0.1 * jax.random.normal(ks[8], (C4,), jnp.float32),
            bn2_mean=0.1 * jax.random.normal(ks[9], (C4,), jnp.float32),
            bn2_var=jax.random.uniform(ks[10], (C4,), jnp.float32, 0.5, 1.5),
            wd2=kaiming(ks[11], (C4, 1, 2, 2), C4 * 4),           # ConvT (I,1,2,2)
            bd2=0.05 * jnp.ones((1,), jnp.float32),
        )

    k1, k2 = jax.random.split(key)
    return {"binarize": branch(k1), "thresh": branch(k2)}


# ----------------------------- pure-JAX reference ----------------------------
def ref_forward(x_nchw, params):
    x = jnp.transpose(x_nchw, (0, 2, 3, 1)).astype(jnp.float32)   # NHWC

    def bn(h, p, pre):
        return ((h - p[pre + "_mean"]) / jnp.sqrt(p[pre + "_var"] + EPS)
                * p[pre + "_gamma"] + p[pre + "_beta"])

    def deconv2x2(h, w, b):                                       # w: (Cin,Cout,2,2)
        y = jnp.einsum("nhwi,ioab->nhawbo", h, w, precision=HP)
        n, hh, _, ww, _, co = y.shape
        return y.reshape(n, 2 * hh, 2 * ww, co) + b

    def branch(p):
        w3 = jnp.transpose(p["w3"], (2, 3, 1, 0))                 # HWIO
        h = lax.conv_general_dilated(x, w3, (1, 1), "SAME",
                                     dimension_numbers=("NHWC", "HWIO", "NHWC"),
                                     precision=HP)
        h = jnp.maximum(bn(h, p, "bn1"), 0.0)
        h = deconv2x2(h, p["wd1"], p["bd1"])
        h = jnp.maximum(bn(h, p, "bn2"), 0.0)
        h = deconv2x2(h, p["wd2"], p["bd2"])
        return jax.nn.sigmoid(h)                                  # (N,4H,4W,1)

    y = jnp.concatenate([branch(params["binarize"]), branch(params["thresh"])],
                        axis=-1)                                  # (N,4H,4W,2)
    return jnp.transpose(y, (0, 3, 1, 2))                         # NCHW


# ---------------------------------- main -------------------------------------
if __name__ == "__main__":
    key = jax.random.PRNGKey(0)
    kx, kp = jax.random.split(key)

    N, C, H, W = 2, 16, 16, 16                # in_channels=16 -> in_channels//4 = 4
    x = jax.random.normal(kx, (N, C, H, W), jnp.float32)
    params = init_params(kp, C)

    y = jax.jit(db_head_forward)(x, params)
    y = jax.block_until_ready(y)

    assert y.shape == (N, 2, 4 * H, 4 * W), y.shape

    # Kernel computes matmuls in bf16 (f32 accumulate) + approx reciprocal sigmoid;
    # reference is f32 HIGHEST, so the check is deliberately loosened (outputs in [0,1]).
    y_ref = ref_forward(x, params)
    max_err = float(jnp.max(jnp.abs(y - y_ref)))
    assert max_err < 3e-2, f"max abs err {max_err}"

    print("KERNEL_OK")
</pallas_src>

<mosaic_0001>
module attributes {stable_mosaic.version = 11 : i64} {
  func.func @_db_head_kernel(%arg0: i32, %arg1: memref<1x18x18x16xf32, #tpu.memory_space<vmem>>, %arg2: memref<144x8xbf16, #tpu.memory_space<vmem>>, %arg3: memref<1x8xf32, #tpu.memory_space<vmem>>, %arg4: memref<8x32xbf16, #tpu.memory_space<vmem>>, %arg5: memref<1x32xf32, #tpu.memory_space<vmem>>, %arg6: memref<32x32xbf16, #tpu.memory_space<vmem>>, %arg7: memref<1x32xf32, #tpu.memory_space<vmem>>, %arg8: memref<1x32x256xf32, #tpu.memory_space<vmem>>) attributes {dimension_semantics = [#tpu.dimension_semantics<parallel>], iteration_bounds = array<i64: 2>, scalar_prefetch = 0 : i64, scratch_operands = 0 : i64, tpu.core_type = #tpu.core_type<tc>, window_params = [{transform_indices = @transform_0, window_bounds = array<i64: 1, 18, 18, 16>}, {pipeline_mode = #tpu.pipeline_mode<synchronous>, transform_indices = @transform_1, window_bounds = array<i64: 144, 8>}, {pipeline_mode = #tpu.pipeline_mode<synchronous>, transform_indices = @transform_2, window_bounds = array<i64: 1, 8>}, {pipeline_mode = #tpu.pipeline_mode<synchronous>, transform_indices = @transform_3, window_bounds = array<i64: 8, 32>}, {pipeline_mode = #tpu.pipeline_mode<synchronous>, transform_indices = @transform_4, window_bounds = array<i64: 1, 32>}, {pipeline_mode = #tpu.pipeline_mode<synchronous>, transform_indices = @transform_5, window_bounds = array<i64: 32, 32>}, {pipeline_mode = #tpu.pipeline_mode<synchronous>, transform_indices = @transform_6, window_bounds = array<i64: 1, 32>}, {transform_indices = @transform_7, window_bounds = array<i64: 1, 32, 256>}]} {
    %c0 = arith.constant 0 : index
    %c0_0 = arith.constant 0 : index
    %c0_1 = arith.constant 0 : index
    %c0_2 = arith.constant 0 : index
    %0 = vector.load %arg1[%c0, %c0_0, %c0_1, %c0_2] : memref<1x18x18x16xf32, #tpu.memory_space<vmem>>, vector<1x16x16x16xf32>
    %1 = vector.shape_cast %0 : vector<1x16x16x16xf32> to vector<16x16x16xf32>
    %2 = vector.shape_cast %1 : vector<16x16x16xf32> to vector<256x16xf32>
    %c0_3 = arith.constant 0 : index
    %c0_4 = arith.constant 0 : index
    %c1 = arith.constant 1 : index
    %c0_5 = arith.constant 0 : index
    %3 = vector.load %arg1[%c0_3, %c0_4, %c1, %c0_5] : memref<1x18x18x16xf32, #tpu.memory_space<vmem>>, vector<1x16x16x16xf32>
    %4 = vector.shape_cast %3 : vector<1x16x16x16xf32> to vector<16x16x16xf32>
    %5 = vector.shape_cast %4 : vector<16x16x16xf32> to vector<256x16xf32>
    %c0_6 = arith.constant 0 : index
    %c0_7 = arith.constant 0 : index
    %c2 = arith.constant 2 : index
    %c0_8 = arith.constant 0 : index
    %6 = vector.load %arg1[%c0_6, %c0_7, %c2, %c0_8] : memref<1x18x18x16xf32, #tpu.memory_space<vmem>>, vector<1x16x16x16xf32>
    %7 = vector.shape_cast %6 : vector<1x16x16x16xf32> to vector<16x16x16xf32>
    %8 = vector.shape_cast %7 : vector<16x16x16xf32> to vector<256x16xf32>
    %c0_9 = arith.constant 0 : index
    %c1_10 = arith.constant 1 : index
    %c0_11 = arith.constant 0 : index
    %c0_12 = arith.constant 0 : index
    %9 = vector.load %arg1[%c0_9, %c1_10, %c0_11, %c0_12] : memref<1x18x18x16xf32, #tpu.memory_space<vmem>>, vector<1x16x16x16xf32>
    %10 = vector.shape_cast %9 : vector<1x16x16x16xf32> to vector<16x16x16xf32>
    %11 = vector.shape_cast %10 : vector<16x16x16xf32> to vector<256x16xf32>
    %c0_13 = arith.constant 0 : index
    %c1_14 = arith.constant 1 : index
    %c1_15 = arith.constant 1 : index
    %c0_16 = arith.constant 0 : index
    %12 = vector.load %arg1[%c0_13, %c1_14, %c1_15, %c0_16] : memref<1x18x18x16xf32, #tpu.memory_space<vmem>>, vector<1x16x16x16xf32>
    %13 = vector.shape_cast %12 : vector<1x16x16x16xf32> to vector<16x16x16xf32>
    %14 = vector.shape_cast %13 : vector<16x16x16xf32> to vector<256x16xf32>
    %c0_17 = arith.constant 0 : index
    %c1_18 = arith.constant 1 : index
    %c2_19 = arith.constant 2 : index
    %c0_20 = arith.constant 0 : index
    %15 = vector.load %arg1[%c0_17, %c1_18, %c2_19, %c0_20] : memref<1x18x18x16xf32, #tpu.memory_space<vmem>>, vector<1x16x16x16xf32>
    %16 = vector.shape_cast %15 : vector<1x16x16x16xf32> to vector<16x16x16xf32>
    %17 = vector.shape_cast %16 : vector<16x16x16xf32> to vector<256x16xf32>
    %c0_21 = arith.constant 0 : index
    %c2_22 = arith.constant 2 : index
    %c0_23 = arith.constant 0 : index
    %c0_24 = arith.constant 0 : index
    %18 = vector.load %arg1[%c0_21, %c2_22, %c0_23, %c0_24] : memref<1x18x18x16xf32, #tpu.memory_space<vmem>>, vector<1x16x16x16xf32>
    %19 = vector.shape_cast %18 : vector<1x16x16x16xf32> to vector<16x16x16xf32>
    %20 = vector.shape_cast %19 : vector<16x16x16xf32> to vector<256x16xf32>
    %c0_25 = arith.constant 0 : index
    %c2_26 = arith.constant 2 : index
    %c1_27 = arith.constant 1 : index
    %c0_28 = arith.constant 0 : index
    %21 = vector.load %arg1[%c0_25, %c2_26, %c1_27, %c0_28] : memref<1x18x18x16xf32, #tpu.memory_space<vmem>>, vector<1x16x16x16xf32>
    %22 = vector.shape_cast %21 : vector<1x16x16x16xf32> to vector<16x16x16xf32>
    %23 = vector.shape_cast %22 : vector<16x16x16xf32> to vector<256x16xf32>
    %c0_29 = arith.constant 0 : index
    %c2_30 = arith.constant 2 : index
    %c2_31 = arith.constant 2 : index
    %c0_32 = arith.constant 0 : index
    %24 = vector.load %arg1[%c0_29, %c2_30, %c2_31, %c0_32] : memref<1x18x18x16xf32, #tpu.memory_space<vmem>>, vector<1x16x16x16xf32>
    %25 = vector.shape_cast %24 : vector<1x16x16x16xf32> to vector<16x16x16xf32>
    %26 = vector.shape_cast %25 : vector<16x16x16xf32> to vector<256x16xf32>
    %27 = tpu.concatenate %2, %5, %8, %11, %14, %17, %20, %23, %26 in 1 : vector<256x16xf32>, vector<256x16xf32>, vector<256x16xf32>, vector<256x16xf32>, vector<256x16xf32>, vector<256x16xf32>, vector<256x16xf32>, vector<256x16xf32>, vector<256x16xf32> -> vector<256x144xf32>
    %28 = arith.truncf %27 : vector<256x144xf32> to vector<256x144xbf16>
    %c0_33 = arith.constant 0 : index
    %c0_34 = arith.constant 0 : index
    %29 = vector.load %arg2[%c0_33, %c0_34] : memref<144x8xbf16, #tpu.memory_space<vmem>>, vector<144x8xbf16>
    %cst = arith.constant dense<0.000000e+00> : vector<256x8xf32>
    %30 = tpu.matmul %28, %29, %cst {dimension_numbers = #tpu.dot_dimension_numbers<[1], [0], [0], [1], [0, 0, 1, 1], [], []>} : vector<256x144xbf16>, vector<144x8xbf16>, vector<256x8xf32> -> vector<256x8xf32>
    %c0_35 = arith.constant 0 : index
    %c0_36 = arith.constant 0 : index
    %31 = vector.load %arg3[%c0_35, %c0_36] : memref<1x8xf32, #tpu.memory_space<vmem>>, vector<1x8xf32>
    %32 = vector.broadcast %31 : vector<1x8xf32> to vector<256x8xf32>
    %33 = arith.addf %30, %32 : vector<256x8xf32>
    %cst_37 = arith.constant 0.000000e+00 : f32
    %34 = vector.broadcast %cst_37 : f32 to vector<256x8xf32>
    %35 = arith.maximumf %33, %34 : vector<256x8xf32>
    %36 = arith.truncf %35 : vector<256x8xf32> to vector<256x8xbf16>
    %c0_38 = arith.constant 0 : index
    %c0_39 = arith.constant 0 : index
    %37 = vector.load %arg4[%c0_38, %c0_39] : memref<8x32xbf16, #tpu.memory_space<vmem>>, vector<8x32xbf16>
    %cst_40 = arith.constant dense<0.000000e+00> : vector<256x32xf32>
    %38 = tpu.matmul %36, %37, %cst_40 {dimension_numbers = #tpu.dot_dimension_numbers<[1], [0], [0], [1], [0, 0, 1, 1], [], []>} : vector<256x8xbf16>, vector<8x32xbf16>, vector<256x32xf32> -> vector<256x32xf32>
    %c0_41 = arith.constant 0 : index
    %c0_42 = arith.constant 0 : index
    %39 = vector.load %arg5[%c0_41, %c0_42] : memref<1x32xf32, #tpu.memory_space<vmem>>, vector<1x32xf32>
    %40 = vector.broadcast %39 : vector<1x32xf32> to vector<256x32xf32>
    %41 = arith.addf %38, %40 : vector<256x32xf32>
    %cst_43 = arith.constant 0.000000e+00 : f32
    %42 = vector.broadcast %cst_43 : f32 to vector<256x32xf32>
    %43 = arith.maximumf %41, %42 : vector<256x32xf32>
    %44 = arith.truncf %43 : vector<256x32xf32> to vector<256x32xbf16>
    %c0_44 = arith.constant 0 : index
    %c0_45 = arith.constant 0 : index
    %45 = vector.load %arg6[%c0_44, %c0_45] : memref<32x32xbf16, #tpu.memory_space<vmem>>, vector<32x32xbf16>
    %cst_46 = arith.constant dense<0.000000e+00> : vector<256x32xf32>
    %46 = tpu.matmul %44, %45, %cst_46 {dimension_numbers = #tpu.dot_dimension_numbers<[1], [0], [0], [1], [0, 0, 1, 1], [], []>} : vector<256x32xbf16>, vector<32x32xbf16>, vector<256x32xf32> -> vector<256x32xf32>
    %c0_47 = arith.constant 0 : index
    %c0_48 = arith.constant 0 : index
    %47 = vector.load %arg7[%c0_47, %c0_48] : memref<1x32xf32, #tpu.memory_space<vmem>>, vector<1x32xf32>
    %48 = vector.broadcast %47 : vector<1x32xf32> to vector<256x32xf32>
    %49 = arith.addf %46, %48 : vector<256x32xf32>
    %50 = tpu.transpose %49, [1, 0] : vector<256x32xf32> -> vector<32x256xf32>
    %cst_49 = arith.constant 0.000000e+00 : f32
    %51 = vector.broadcast %cst_49 : f32 to vector<32x256xf32>
    %52 = arith.subf %51, %50 : vector<32x256xf32>
    %53 = math.exp %52 : vector<32x256xf32>
    %cst_50 = arith.constant 1.000000e+00 : f32
    %54 = vector.broadcast %cst_50 : f32 to vector<32x256xf32>
    %55 = arith.addf %54, %53 : vector<32x256xf32>
    %56 = tpu.reciprocal %55 {approx = true} : vector<32x256xf32> -> vector<32x256xf32>
    %c0_51 = arith.constant 0 : index
    %c0_52 = arith.constant 0 : index
    %c0_53 = arith.constant 0 : index
    %57 = vector.load %arg8[%c0_51, %c0_52, %c0_53] : memref<1x32x256xf32, #tpu.memory_space<vmem>>, vector<1x32x256xf32>
    %58 = vector.shape_cast %57 : vector<1x32x256xf32> to vector<32x256xf32>
    %59 = vector.shape_cast %56 : vector<32x256xf32> to vector<1x32x256xf32>
    tpu.vector_store %arg8[%c0_51, %c0_52, %c0_53], %59 {strides = array<i32>} : memref<1x32x256xf32, #tpu.memory_space<vmem>>, vector<1x32x256xf32>,
    return
  }
  func.func @transform_0(%arg0: i32) -> (i32, i32, i32, i32) {
    %c0_i32 = arith.constant 0 : i32
    %c0_i32_0 = arith.constant 0 : i32
    %c0_i32_1 = arith.constant 0 : i32
    %c0_i32_2 = arith.constant 0 : i32
    return %arg0, %c0_i32, %c0_i32_0, %c0_i32_1 : i32, i32, i32, i32
  }
  func.func @transform_1(%arg0: i32) -> (i32, i32) {
    %c0_i32 = arith.constant 0 : i32
    %c0_i32_0 = arith.constant 0 : i32
    %c0_i32_1 = arith.constant 0 : i32
    return %c0_i32, %c0_i32_0 : i32, i32
  }
  func.func @transform_2(%arg0: i32) -> (i32, i32) {
    %c0_i32 = arith.constant 0 : i32
    %c0_i32_0 = arith.constant 0 : i32
    %c0_i32_1 = arith.constant 0 : i32
    return %c0_i32, %c0_i32_0 : i32, i32
  }
  func.func @transform_3(%arg0: i32) -> (i32, i32) {
    %c0_i32 = arith.constant 0 : i32
    %c0_i32_0 = arith.constant 0 : i32
    %c0_i32_1 = arith.constant 0 : i32
    return %c0_i32, %c0_i32_0 : i32, i32
  }
  func.func @transform_4(%arg0: i32) -> (i32, i32) {
    %c0_i32 = arith.constant 0 : i32
    %c0_i32_0 = arith.constant 0 : i32
    %c0_i32_1 = arith.constant 0 : i32
    return %c0_i32, %c0_i32_0 : i32, i32
  }
  func.func @transform_5(%arg0: i32) -> (i32, i32) {
    %c0_i32 = arith.constant 0 : i32
    %c0_i32_0 = arith.constant 0 : i32
    %c0_i32_1 = arith.constant 0 : i32
    return %c0_i32, %c0_i32_0 : i32, i32
  }
  func.func @transform_6(%arg0: i32) -> (i32, i32) {
    %c0_i32 = arith.constant 0 : i32
    %c0_i32_0 = arith.constant 0 : i32
    %c0_i32_1 = arith.constant 0 : i32
    return %c0_i32, %c0_i32_0 : i32, i32
  }
  func.func @transform_7(%arg0: i32) -> (i32, i32, i32) {
    %c0_i32 = arith.constant 0 : i32
    %c0_i32_0 = arith.constant 0 : i32
    %c0_i32_1 = arith.constant 0 : i32
    return %arg0, %c0_i32, %c0_i32_0 : i32, i32, i32
  }
}

</mosaic_0001>

<bundles_post_ra>
// kernel: tile.33
= control target key start
LH: loop header
LB: loop body
LE: loop exit
PB: predicated region body
PF: predicated region fallthrough
CT: control target
= control target key end

     0   :  { %s22_s0 = inlined_call_operand.vmem [shape: f32[4], index: 0, kind: input, shape index: {}]   ;;  %s23_s1 = inlined_call_operand.vmem [shape: f32[4,4], index: 1, kind: output, shape index: {}]  }
   0x1   :  { %v4_v0 = vld [vmem:[%s22_s0] ss:$0 sm:$0xff] }
   0x2   :  { %5 = vst [vmem:[%s23_s1] sm:$0xf] %v4_v0 }

// kernel: tile.34
= control target key start
LH: loop header
LB: loop body
LE: loop exit
PB: predicated region body
PF: predicated region fallthrough
CT: control target
= control target key end

     0   :  { %vm7_vm0 = vcmask 31744   ;;  %s37_s8 = smov 4   ;;  %s38_s9 = smov 8   ;;  %vm13_vm1 = vcmask 130144   ;;  %vm19_vm2 = vcmask 97344   ;;  %vm25_vm3 = vcmask 64544   ;;  %s55_s0 = inlined_call_operand.vmem [shape: f32[4,4], index: 0, kind: input, shape index: {}]   ;;  %s56_s1 = inlined_call_operand.vmem [shape: f32[16], index: 1, kind: output, shape index: {}]  }
   0x1   :  { %v4_v0 = vld [vmem:[%s55_s0] sm:$0xf]  ;;  %s36_s0 = smov 12  }
   0x2   :  { %5 = vst [vmem:[#allocation1] sm:$0xf] %v4_v0 }
   0x9   :  { %v10_v1 = vld [vmem:[#allocation1 + $0x3] sm:$0x1]   ;;  %v22_v2 = vld [vmem:[#allocation1 + $0x1] sm:$0x1]   ;;  %v6_v3 = vld [vmem:[#allocation1] sm:$0x1]  }
   0xa   :  { %11 = vrot.lane.b32.xlu0 %v10_v1, %s36_s0  ;;  %23 = vrot.lane.b32.xlu1 %v22_v2, %s37_s8  ;;  %v16_v4 = vld [vmem:[#allocation1 + $0x2] sm:$0x1]   ;;  %8 = vst.msk [vmem:[#allocation0] sm:$0x1] %vm7_vm0, %v6_v3  }
   0xe   :  { %17 = vrot.lane.b32.xlu0 %v16_v4, %s38_s9 }
  0x7c   :  { %v12_v5 = vpop.permute.xlu0 %11   ;;  %v24_v6 = vpop.permute.xlu1 %23  }
  0x7d   :  { %14 = vst.msk [vmem:[#allocation0] sm:$0x1] %vm13_vm1, %v12_v5  }
  0x80   :  { %v18_v7 = vpop.permute.xlu0 %17  }
  0x81   :  { %20 = vst.msk [vmem:[#allocation0] sm:$0x1] %vm19_vm2, %v18_v7  }
  0x82   :  { %26 = vst.msk [vmem:[#allocation0] sm:$0x1] %vm25_vm3, %v24_v6  }
  0x89   :  { %v30_v8 = vld [vmem:[#allocation0] sm:$0x1] }
  0x8a   :  { %32 = vst [vmem:[%s56_s1] sm:$0x1] %v30_v8 }

// kernel: db_head_forward.1
= control target key start
LH: loop header
LB: loop body
LE: loop exit
PB: predicated region body
PF: predicated region fallthrough
CT: control target
= control target key end

     0   :  { %s3781_s24 = smov 0   ;;  %s4658_s0 = inlined_call_operand.vmem [shape: f32[2,18,18,16], index: 0, kind: input, shape index: {}]   ;;  %s4659_s1 = inlined_call_operand.vmem [shape: bf16[144,8], index: 1, kind: input, shape index: {}]   ;;  %s4660_s2 = inlined_call_operand.vmem [shape: f32[1,8], index: 2, kind: input, shape index: {}]   ;;  %s4661_s3 = inlined_call_operand.vmem [shape: bf16[8,32], index: 3, kind: input, shape index: {}]   ;;  %s4662_s4 = inlined_call_operand.vmem [shape: f32[1,32], index: 4, kind: input, shape index: {}]   ;;  %s4663_s5 = inlined_call_operand.vmem [shape: bf16[32,32], index: 5, kind: input, shape index: {}]   ;;  %s4664_s6 = inlined_call_operand.vmem [shape: f32[1,32], index: 6, kind: input, shape index: {}]   ;;  %s4665_s7 = inlined_call_operand.vmem [shape: f32[2,32,256], index: 7, kind: output, shape index: {}]  }
   0x1 LB: > { %s2734_s25 = sadd.s32 4294967295, %s3731_s24   ;;  %p2738_p0 = scmp.ge.s32.totalorder %s3731_s24, 1  ;;  %s3731_s24 = sphi %s3781_s24, %s17_s24  }
   0x2   : > { %p237_p1 = scmp.lt.s32.totalorder %s3731_s24, 3 }
   0x4   : > { %p238_p2 = pnand %p2738_p0, %p237_p1 }
   0x5   : > { %p269_p3 = scmp.lt.s32.totalorder (!%p238_p2), %s2734_s25, 1  ;;  %v3682_v0 = vld [vmem:[%s4659_s1] sm:$0xff] (!%p238_p2)   ;;  %v3733_v1 = vmov (!%p238_p2), 0   ;;  %v3683_v2 = vld [vmem:[%s4659_s1 + $0x8] sm:$0xff] (!%p238_p2)   ;;  %v3684_v3 = vld [vmem:[%s4659_s1 + $0x10] sm:$0xff] (!%p238_p2)   ;;  %s3734_s13 = smov (!%p238_p2), 16  }
   0x6   : > { %241 = sbr.rel (%p238_p2) target bundleno = 1140 (0x474), region = 48  ;;  %1856 = vmatprep.subr.bf16.mxu0 (!%p238_p2), %v3733_v1  ;;  %v3685_v15 = vld [vmem:[%s4659_s1 + $0x18] sm:$0xff] (!%p238_p2)   ;;  %s3735_s16 = smov (!%p238_p2), 48   ;;  %v3686_v25 = vld [vmem:[%s4659_s1 + $0x20] sm:$0xff] (!%p238_p2)   ;;  %vm1466_vm0 = vcmask (!%p238_p2), 130048   ;;  %v3687_v30 = vld [vmem:[%s4659_s1 + $0x28] sm:$0xff] (!%p238_p2)  }
   0x7   : > { %1857 = vmatpush1.bf16.msra.mxu0 (!%p238_p2), %v3682_v0  ;;  %s3736_s17 = smov (!%p238_p2), 32   ;;  %s3737_s20 = smov (!%p238_p2), 64   ;;  %v3688_v37 = vld [vmem:[%s4659_s1 + $0x30] sm:$0xff] (!%p238_p2)   ;;  %v3689_v41 = vld [vmem:[%s4659_s1 + $0x38] sm:$0xff] (!%p238_p2)   ;;  %v3690_v43 = vld [vmem:[%s4659_s1 + $0x40] sm:$0xff] (!%p238_p2)   ;;  %vm1499_vm1 = vcmask (!%p238_p2), 261120  }
   0x8   : > { %1858 = vmatprep.subr.bf16.mxu0 (!%p238_p2), %v3733_v1  ;;  %s3738_s21 = smov (!%p238_p2), 80   ;;  %s3739_s26 = smov (!%p238_p2), 96   ;;  %vm1532_vm2 = vcmask (!%p238_p2), 392192   ;;  %vm1565_vm3 = vcmask (!%p238_p2), 523264   ;;  %vm1598_vm4 = vcmask (!%p238_p2), 654336   ;;  %vm1631_vm5 = vcmask (!%p238_p2), 785408  }
   0x9   : > { %s3740_s27 = smov (!%p238_p2), 112   ;;  %vm1664_vm6 = vcmask (!%p238_p2), 916480   ;;  %vm2122_vm7 = vcmask (!%p238_p2), 1043456   ;;  %vm2073_vm8 = vcmask (!%p238_p2), 64512  }
   0xb   : > { %1859 = vmatpush1.bf16.msra.mxu0 (!%p238_p2), %v3683_v2 }
   0xc   : > { %1860 = vmatprep.subr.bf16.mxu0 (!%p238_p2), %v3733_v1 }
   0xd   : > { %s4667_s25 = smov (!%p269_p3, %s2734_s25), 1 }
   0xe   : > { %s3105_s30 = smul.u32 432, %s4667_s25  ;;  %s2998_s23 = sshll.u32 %s4667_s25, 6 }
   0xf   : > { %1861 = vmatpush1.bf16.msra.mxu0 %v3684_v3  ;;  %s4641_s28 = scalar_lea.vmem %s4665_s7, %s2998_s23 }
  0x10   : > { %s3803_s10 = scalar_lea.vmem %s4658_s0, %s3105_s30  ;;  %1862 = vmatprep.subr.bf16.mxu0 %v3733_v1 }
  0x11   : > { %v312_v4 = vld [vmem:[%s3803_s10 + $0x1] sm:$0xff]  ;;  %v313_v5 = vld [vmem:[%s3803_s10 + $0x9] sm:$0xff]  ;;  %v3811_v6 = vld [vmem:[%s3803_s10 + $0x18] sm:$0xff] }
  0x12   : > { %v3122_v7 = vpack.i.bf16 %v313_v5, %v312_v4  ;;  %v3815_v8 = vld [vmem:[%s3803_s10 + $0x20] sm:$0xff]  ;;  %v345_v10 = vld [vmem:[%s3803_s10 + $0xa] sm:$0xff]  ;;  %v3835_v20 = vld [vmem:[%s3803_s10 + $0x38] sm:$0xff] }
  0x13   : > { %v344_v9 = vld [vmem:[%s3803_s10 + $0x2] sm:$0xff]  ;;  %v3132_v11 = vpack.i.bf16 %v3815_v8, %v3811_v6  ;;  %v2774_v12 = vld [vmem:[%s3803_s10 + $0x19] sm:$0xff]  ;;  %v3831_v19 = vld [vmem:[%s3803_s10 + $0x30] sm:$0xff]  ;;  %1863 = vmatpush1.bf16.msra.mxu0 %v3685_v15 }
  0x14   : > { %v2775_v13 = vld [vmem:[%s3803_s10 + $0x21] sm:$0xff]  ;;  %3123 = vrot.lane.b32.xlu0 %v3122_v7, %s3734_s13  ;;  %v3127_v14 = vpack.i.bf16 %v345_v10, %v344_v9  ;;  %v2808_v21 = vld [vmem:[%s3803_s10 + $0x32] sm:$0xff]  ;;  %v3147_v26 = vpack.i.bf16 %v3835_v20, %v3831_v19  ;;  %1864 = vmatprep.subr.bf16.mxu0 %v3733_v1  ;;  %v3859_v31 = vld [vmem:[%s3803_s10 + $0x4a] sm:$0xff] }
  0x15   : > { %3133 = vrot.lane.b32.xlu1 %v3132_v11, %s3735_s16  ;;  %v3137_v16 = vpack.i.bf16 %v2775_v13, %v2774_v12  ;;  %v2806_v17 = vld [vmem:[%s3803_s10 + $0x1a] sm:$0xff]  ;;  %v2807_v18 = vld [vmem:[%s3803_s10 + $0x22] sm:$0xff]  ;;  %v2870_v27 = vld [vmem:[%s3803_s10 + $0x31] sm:$0xff] }
  0x16   : > { %v2809_v22 = vld [vmem:[%s3803_s10 + $0x3a] sm:$0xff]  ;;  %v3142_v24 = vpack.i.bf16 %v2807_v18, %v2806_v17  ;;  %v3862_v32 = vld [vmem:[%s3803_s10 + $0x52] sm:$0xff]  ;;  %v3869_v34 = vld [vmem:[%s3803_s10 + $0x48] sm:$0xff] }
  0x17   : > { %v1698_v23 = vpack.c.bf16 %v2809_v22, %v2808_v21  ;;  %v2871_v28 = vld [vmem:[%s3803_s10 + $0x39] sm:$0xff]  ;;  %1865 = vmatpush1.bf16.msra.mxu0 %v3686_v25  ;;  %v1700_v33 = vpack.c.bf16 %v3862_v32, %v3859_v31  ;;  %v3872_v35 = vld [vmem:[%s3803_s10 + $0x50] sm:$0xff]  ;;  %v3177_v36 = vpack.i.bf16 %v2809_v22, %v2808_v21  ;;  %v3896_v44 = vld [vmem:[%s3803_s10 + $0x62] sm:$0xff]  ;;  %v3212_v49 = vpack.i.bf16 %v3862_v32, %v3859_v31 }
  0x18   : > { %3128 = vrot.lane.b32.xlu0 %v3127_v14, %s3736_s17  ;;  %v3152_v29 = vpack.i.bf16 %v2871_v28, %v2870_v27  ;;  %1866 = vmatprep.subr.bf16.mxu0 %v3733_v1  ;;  %v2872_v38 = vld [vmem:[%s3803_s10 + $0x49] sm:$0xff]  ;;  %v2873_v39 = vld [vmem:[%s3803_s10 + $0x51] sm:$0xff]  ;;  %v3182_v40 = vpack.i.bf16 %v3872_v35, %v3869_v34  ;;  %v3905_v47 = vld [vmem:[%s3803_s10 + $0x60] sm:$0xff] }
  0x19   : > { %3138 = vrot.lane.b32.xlu1 %v3137_v16, %s3737_s20  ;;  %2944 = vmatprep.mubr.msk.bf16.mxu0 %vm1466_vm0, %v1698_v23  ;;  %v3187_v42 = vpack.i.bf16 %v2873_v39, %v2872_v38  ;;  %v3899_v45 = vld [vmem:[%s3803_s10 + $0x6a] sm:$0xff]  ;;  %v2874_v51 = vld [vmem:[%s3803_s10 + $0x61] sm:$0xff]  ;;  %v2844_v58 = vld [vmem:[%s3803_s10 + $0x78] sm:$0xff] }
  0x1a   : > { %v1702_v46 = vpack.c.bf16 %v3899_v45, %v3896_v44  ;;  %v3908_v48 = vld [vmem:[%s3803_s10 + $0x68] sm:$0xff]  ;;  %v3923_v54 = vld [vmem:[%s3803_s10 + $0x7a] sm:$0xff]  ;;  %v3247_v57 = vpack.i.bf16 %v3899_v45, %v3896_v44  ;;  %v3944_v0 = vld [vmem:[%s3803_s10 + $0x92] sm:$0xff] }
  0x1b   : > { %1867 = vmatpush1.bf16.msra.mxu0 %v3687_v30  ;;  %v3217_v50 = vpack.i.bf16 %v3908_v48, %v3905_v47  ;;  %v2875_v52 = vld [vmem:[%s3803_s10 + $0x69] sm:$0xff]  ;;  %v2845_v59 = vld [vmem:[%s3803_s10 + $0x80] sm:$0xff]  ;;  %v2847_v4 = vld [vmem:[%s3803_s10 + $0x98] sm:$0xff] }
  0x1c   : > { %3143 = vrot.lane.b32.xlu0 %v3142_v24, %s3738_s21  ;;  %1868 = vmatprep.subr.bf16.mxu0 %v3733_v1  ;;  %v3222_v53 = vpack.i.bf16 %v2875_v52, %v2874_v51  ;;  %v3926_v55 = vld [vmem:[%s3803_s10 + $0x82] sm:$0xff]  ;;  %v2876_v60 = vld [vmem:[%s3803_s10 + $0x79] sm:$0xff]  ;;  %v3252_v62 = vpack.i.bf16 %v2845_v59, %v2844_v58  ;;  %v2846_v3 = vld [vmem:[%s3803_s10 + $0x90] sm:$0xff] }
  0x1d   : > { %3148 = vrot.lane.b32.xlu1 %v3147_v26, %s3739_s26  ;;  %v1704_v56 = vpack.c.bf16 %v3926_v55, %v3923_v54  ;;  %v2877_v61 = vld [vmem:[%s3803_s10 + $0x81] sm:$0xff]  ;;  %v3282_v5 = vpack.i.bf16 %v3926_v55, %v3923_v54  ;;  %v3287_v7 = vpack.i.bf16 %v2847_v4, %v2846_v3  ;;  %v2878_v9 = vld [vmem:[%s3803_s10 + $0x91] sm:$0xff]  ;;  %v2879_v10 = vld [vmem:[%s3803_s10 + $0x99] sm:$0xff] }
  0x1e   : > { %v3257_v63 = vpack.i.bf16 %v2877_v61, %v2876_v60  ;;  %v3292_v11 = vpack.i.bf16 %v2879_v10, %v2878_v9  ;;  %v2848_v13 = vld [vmem:[%s3803_s10 + $0xa8] sm:$0xff]  ;;  %v2849_v14 = vld [vmem:[%s3803_s10 + $0xb0] sm:$0xff]  ;;  %v2850_v23 = vld [vmem:[%s3803_s10 + $0xc0] sm:$0xff] }
  0x1f   : > { %1869 = vmatpush1.bf16.msra.mxu0 %v3688_v37  ;;  %v2880_v15 = vld [vmem:[%s3803_s10 + $0xa9] sm:$0xff]  ;;  %v3322_v17 = vpack.i.bf16 %v2849_v14, %v2848_v13  ;;  %v2819_v22 = vld [vmem:[%s3803_s10 + $0xb2] sm:$0xff]  ;;  %v2882_v27 = vld [vmem:[%s3803_s10 + $0xc1] sm:$0xff] }
  0x20   : > { %3153 = vrot.lane.b32.xlu0 %v3152_v29, %s3740_s27  ;;  %1870 = vmatprep.subr.bf16.mxu0 %v3733_v1  ;;  %v2818_v21 = vld [vmem:[%s3803_s10 + $0xaa] sm:$0xff]  ;;  %v2820_v30 = vld [vmem:[%s3803_s10 + $0xc2] sm:$0xff]  ;;  %v2852_v38 = vld [vmem:[%s3803_s10 + $0xd8] sm:$0xff] }
  0x21   : > { %3158 = vrot.lane.b32.xlu1 %v3137_v16, %s3734_s13  ;;  %v2881_v16 = vld [vmem:[%s3803_s10 + $0xb1] sm:$0xff]  ;;  %v3352_v25 = vpack.i.bf16 %v2819_v22, %v2818_v21  ;;  %v2883_v28 = vld [vmem:[%s3803_s10 + $0xc9] sm:$0xff]  ;;  %v2853_v39 = vld [vmem:[%s3803_s10 + $0xe0] sm:$0xff] }
  0x22   : > { %v3327_v18 = vpack.i.bf16 %v2881_v16, %v2880_v15  ;;  %v2854_v52 = vld [vmem:[%s3803_s10 + $0xf0] sm:$0xff]  ;;  %v2887_v59 = vld [vmem:[%s3803_s10 + $0xf9] sm:$0xff]  ;;  %v281_v3 = vld [vmem:[%s3803_s10 + $0x8] sm:$0xff] }
  0x23   : > { %1871 = vmatpush1.bf16.msra.mxu0 %v3689_v41  ;;  %v2885_v41 = vld [vmem:[%s3803_s10 + $0xe1] sm:$0xff]  ;;  %v2886_v58 = vld [vmem:[%s3803_s10 + $0xf1] sm:$0xff] }
  0x24   : > { %3163 = vrot.lane.b32.xlu0 %v3142_v24, %s3736_s17  ;;  %1872 = vmatprep.subr.bf16.mxu0 %v3733_v1  ;;  %v3947_v1 = vld [vmem:[%s3803_s10 + $0x9a] sm:$0xff]  ;;  %v2851_v24 = vld [vmem:[%s3803_s10 + $0xc8] sm:$0xff] }
  0x25   : > { %3168 = vrot.lane.b32.xlu1 %v3147_v26, %s3735_s16  ;;  %v1706_v2 = vpack.c.bf16 %v3947_v1, %v3944_v0  ;;  %v3317_v12 = vpack.i.bf16 %v3947_v1, %v3944_v0  ;;  %v3357_v26 = vpack.i.bf16 %v2851_v24, %v2850_v23 }
  0x27   : > { %1873 = vmatpush1.bf16.msra.mxu0 %v3690_v43 }
  0x28   : > { %3173 = vrot.lane.b32.xlu0 %v3152_v29, %s3737_s20 }
  0x29   : > { %3178 = vrot.lane.b32.xlu1 %v3177_v36, %s3738_s21 }
  0x2c   : > { %3183 = vrot.lane.b32.xlu0 %v3182_v40, %s3739_s26 }
  0x2d   : > { %3188 = vrot.lane.b32.xlu1 %v3187_v42, %s3740_s27 }
  0x30   : > { %3193 = vrot.lane.b32.xlu0 %v3152_v29, %s3734_s13  ;;  %v3362_v29 = vpack.i.bf16 %v2883_v28, %v2882_v27 }
  0x31   : > { %3198 = vrot.lane.b32.xlu1 %v3177_v36, %s3736_s17  ;;  %v2821_v36 = vld [vmem:[%s3803_s10 + $0xca] sm:$0xff] }
  0x32   : > { %v3387_v37 = vpack.i.bf16 %v2821_v36, %v2820_v30 }
  0x34   : > { %3203 = vrot.lane.b32.xlu0 %v3182_v40, %s3735_s16  ;;  %v2884_v40 = vld [vmem:[%s3803_s10 + $0xd9] sm:$0xff] }
  0x35   : > { %3208 = vrot.lane.b32.xlu1 %v3187_v42, %s3737_s20  ;;  %v3397_v43 = vpack.i.bf16 %v2885_v41, %v2884_v40  ;;  %v2824_v40 = vld [vmem:[%s3803_s10 + $0xf2] sm:$0xff]  ;;  %v2825_v41 = vld [vmem:[%s3803_s10 + $0xfa] sm:$0xff] }
  0x38   : > { %3213 = vrot.lane.b32.xlu0 %v3212_v49, %s3738_s21 }
  0x39   : > { %3218 = vrot.lane.b32.xlu1 %v3217_v50, %s3739_s26 }
  0x3c   : > { %3223 = vrot.lane.b32.xlu0 %v3222_v53, %s3740_s27 }
  0x3d   : > { %3228 = vrot.lane.b32.xlu1 %v3187_v42, %s3734_s13  ;;  %v3392_v42 = vpack.i.bf16 %v2853_v39, %v2852_v38 }
  0x40   : > { %3233 = vrot.lane.b32.xlu0 %v3212_v49, %s3736_s17  ;;  %v2822_v49 = vld [vmem:[%s3803_s10 + $0xda] sm:$0xff] }
  0x41   : > { %3238 = vrot.lane.b32.xlu1 %v3217_v50, %s3735_s16  ;;  %v2823_v50 = vld [vmem:[%s3803_s10 + $0xe2] sm:$0xff] }
  0x44   : > { %3243 = vrot.lane.b32.xlu0 %v3222_v53, %s3737_s20 }
  0x45   : > { %3248 = vrot.lane.b32.xlu1 %v3247_v57, %s3738_s21 }
  0x48   : > { %3253 = vrot.lane.b32.xlu0 %v3252_v62, %s3739_s26 }
  0x49   : > { %3258 = vrot.lane.b32.xlu1 %v3257_v63, %s3740_s27 }
  0x4c   : > { %3263 = vrot.lane.b32.xlu0 %v3222_v53, %s3734_s13  ;;  %v2855_v53 = vld [vmem:[%s3803_s10 + $0xf8] sm:$0xff] }
  0x4d   : > { %3268 = vrot.lane.b32.xlu1 %v3247_v57, %s3736_s17  ;;  %v3427_v4 = vpack.i.bf16 %v2855_v53, %v2854_v52 }
  0x50   : > { %3273 = vrot.lane.b32.xlu0 %v3252_v62, %s3735_s16  ;;  %v3422_v62 = vpack.i.bf16 %v2823_v50, %v2822_v49 }
  0x51   : > { %3278 = vrot.lane.b32.xlu1 %v3257_v63, %s3737_s20 }
  0x54   : > { %3283 = vrot.lane.b32.xlu0 %v3282_v5, %s3738_s21 }
  0x55   : > { %3288 = vrot.lane.b32.xlu1 %v3287_v7, %s3739_s26 }
  0x58   : > { %3293 = vrot.lane.b32.xlu0 %v3292_v11, %s3740_s27 }
  0x59   : > { %3298 = vrot.lane.b32.xlu1 %v3257_v63, %s3734_s13  ;;  %v280_v63 = vld [vmem:[%s3803_s10] sm:$0xff] }
  0x5c   : > { %3303 = vrot.lane.b32.xlu0 %v3282_v5, %s3736_s17 }
  0x5d   : > { %3308 = vrot.lane.b32.xlu1 %v3287_v7, %s3735_s16  ;;  %v4014_v7 = vpack.i.bf16 %v2887_v59, %v2886_v58  ;;  %v2856_v58 = vld [vmem:[%s3803_s10 + $0x108] sm:$0xff] }
  0x60   : > { %3313 = vrot.lane.b32.xlu0 %v3292_v11, %s3737_s20 }
  0x61   : > { %3318 = vrot.lane.b32.xlu1 %v3317_v12, %s3738_s21 }
  0x64   : > { %3323 = vrot.lane.b32.xlu0 %v3322_v17, %s3739_s26 }
  0x65   : > { %3328 = vrot.lane.b32.xlu1 %v3327_v18, %s3740_s27 }
  0x68   : > { %3333 = vrot.lane.b32.xlu0 %v3292_v11, %s3734_s13 }
  0x69   : > { %3338 = vrot.lane.b32.xlu1 %v3317_v12, %s3736_s17 }
  0x6c   : > { %3343 = vrot.lane.b32.xlu0 %v3322_v17, %s3735_s16 }
  0x6d   : > { %3348 = vrot.lane.b32.xlu1 %v3327_v18, %s3737_s20 }
  0x70   : > { %3353 = vrot.lane.b32.xlu0 %v3352_v25, %s3738_s21 }
  0x71   : > { %3358 = vrot.lane.b32.xlu1 %v3357_v26, %s3739_s26 }
  0x74   : > { %3363 = vrot.lane.b32.xlu0 %v3362_v29, %s3740_s27 }
  0x75   : > { %3368 = vrot.lane.b32.xlu1 %v3327_v18, %s3734_s13 }
  0x78   : > { %3373 = vrot.lane.b32.xlu0 %v3352_v25, %s3736_s17 }
  0x79   : > { %3378 = vrot.lane.b32.xlu1 %v3357_v26, %s3735_s16 }
  0x7c   : > { %3383 = vrot.lane.b32.xlu0 %v3362_v29, %s3737_s20 }
  0x7d   : > { %3388 = vrot.lane.b32.xlu1 %v3387_v37, %s3738_s21 }
  0x80   : > { %3393 = vrot.lane.b32.xlu0 %v3392_v42, %s3739_s26 }
  0x81   : > { %3398 = vrot.lane.b32.xlu1 %v3397_v43, %s3740_s27 }
  0x84   : > { %3403 = vrot.lane.b32.xlu0 %v3362_v29, %s3734_s13 }
  0x85   : > { %3408 = vrot.lane.b32.xlu1 %v3387_v37, %s3736_s17 }
  0x86   : > { %v3124_v51 = vpop.permute.xlu0 %3123 }
  0x87   : > { %v3134_v57 = vpop.permute.xlu1 %3133  ;;  %v3126_v60 = vunpack.i.h.bf16 %v3124_v51  ;;  %v3125_v61 = vunpack.i.l.bf16 %v3124_v51 }
  0x88   : > { %3413 = vrot.lane.b32.xlu0 %v3392_v42, %s3735_s16  ;;  %v3136_v9 = vunpack.i.h.bf16 %v3134_v57  ;;  %v3135_v10 = vunpack.i.l.bf16 %v3134_v57 }
  0x89   : > { %3418 = vrot.lane.b32.xlu1 %v3397_v43, %s3737_s20  ;;  %v1467_v14 = vsel %vm1466_vm0, %v280_v63, %v3125_v61  ;;  %v1468_v15 = vsel %vm1466_vm0, %v281_v3, %v3126_v60  ;;  %v3457_v61 = vpack.i.bf16 %v2825_v41, %v2824_v40  ;;  %v4073_v41 = vld [vmem:[%s3803_s10 + $0x10a] sm:$0xff] }
  0x8a   : > { %v3129_v5 = vpop.permute.xlu0 %3128 }
  0x8b   : > { %v3131_v11 = vunpack.i.h.bf16 %v3129_v5  ;;  %v3130_v12 = vunpack.i.l.bf16 %v3129_v5  ;;  %v3139_v13 = vpop.permute.xlu1 %3138  ;;  %v2888_v5 = vld [vmem:[%s3803_s10 + $0x109] sm:$0xff] }
  0x8c   : > { %v3141_v16 = vunpack.i.h.bf16 %v3139_v13  ;;  %v3140_v17 = vunpack.i.l.bf16 %v3139_v13  ;;  %3423 = vrot.lane.b32.xlu0 %v3422_v62, %s3738_s21 }
  0x8d   : > { %v1500_v18 = vsel %vm1499_vm1, %v1467_v14, %v3130_v12  ;;  %v1501_v21 = vsel %vm1499_vm1, %v1468_v15, %v3131_v11  ;;  %3428 = vrot.lane.b32.xlu1 %v3427_v4, %s3739_s26 }
  0x8e   : > { %v1533_v22 = vsel %vm1532_vm2, %v1500_v18, %v3135_v10  ;;  %v1534_v23 = vsel %vm1532_vm2, %v1501_v21, %v3136_v9  ;;  %v3144_v24 = vpop.permute.xlu0 %3143  ;;  %v2889_v9 = vld [vmem:[%s3803_s10 + $0x111] sm:$0xff] }
  0x8f   : > { %v1566_v25 = vsel %vm1565_vm3, %v1533_v22, %v3140_v17  ;;  %v1567_v26 = vsel %vm1565_vm3, %v1534_v23, %v3141_v16  ;;  %v3146_v27 = vunpack.i.h.bf16 %v3144_v24  ;;  %v3145_v28 = vunpack.i.l.bf16 %v3144_v24  ;;  %v3149_v29 = vpop.permute.xlu1 %3148 }
  0x90   : > { %v3151_v30 = vunpack.i.h.bf16 %v3149_v29  ;;  %v3150_v36 = vunpack.i.l.bf16 %v3149_v29  ;;  %3433 = vrot.lane.b32.xlu0 %v4014_v7, %s3740_s27  ;;  %v4052_v18 = vpack.i.bf16 %v2889_v9, %v2888_v5 }
  0x91   : > { %v1599_v37 = vsel %vm1598_vm4, %v1566_v25, %v3145_v28  ;;  %v1600_v38 = vsel %vm1598_vm4, %v1567_v26, %v3146_v27  ;;  %3438 = vrot.lane.b32.xlu1 %v3397_v43, %s3734_s13  ;;  %v2857_v43 = vld [vmem:[%s3803_s10 + $0x110] sm:$0xff] }
  0x92   : > { %v3154_v39 = vpop.permute.xlu0 %3153  ;;  %v1632_v53 = vsel %vm1631_vm5, %v1599_v37, %v3150_v36  ;;  %v1633_v57 = vsel %vm1631_vm5, %v1600_v38, %v3151_v30  ;;  %v3462_v12 = vpack.i.bf16 %v2857_v43, %v2856_v58 }
  0x93   : > { %v3156_v42 = vunpack.i.h.bf16 %v3154_v39  ;;  %v3155_v49 = vunpack.i.l.bf16 %v3154_v39  ;;  %v3159_v50 = vpop.permute.xlu1 %3158 }
  0x94   : > { %v3161_v51 = vunpack.i.h.bf16 %v3159_v50  ;;  %v3160_v52 = vunpack.i.l.bf16 %v3159_v50  ;;  %3443 = vrot.lane.b32.xlu0 %v3422_v62, %s3736_s17 }
  0x95   : > { %3448 = vrot.lane.b32.xlu1 %v3427_v4, %s3735_s16  ;;  %v1665_v59 = vsel %vm1664_vm6, %v1632_v53, %v3155_v49  ;;  %v1666_v60 = vsel %vm1664_vm6, %v1633_v57, %v3156_v42  ;;  %v4076_v42 = vld [vmem:[%s3803_s10 + $0x112] sm:$0xff]  ;;  %v2859_v53 = vld [vmem:[%s3803_s10 + $0x128] sm:$0xff] }
  0x96   : > { %v3164_v63 = vpop.permute.xlu0 %3163  ;;  %v1697_v3 = vpack.c.bf16 %v1666_v60, %v1665_v59  ;;  %v1469_v13 = vsel %vm1466_vm0, %v3811_v6, %v3160_v52  ;;  %v1470_v14 = vsel %vm1466_vm0, %v3815_v8, %v3161_v51  ;;  %v2858_v52 = vld [vmem:[%s3803_s10 + $0x120] sm:$0xff] }
  0x97   : > { %v3166_v10 = vunpack.i.h.bf16 %v3164_v63  ;;  %v3165_v11 = vunpack.i.l.bf16 %v3164_v63  ;;  %v3169_v62 = vpop.permute.xlu1 %3168  ;;  %v2890_v63 = vld [vmem:[%s3803_s10 + $0x121] sm:$0xff] }
  0x98   : > { %v3171_v4 = vunpack.i.h.bf16 %v3169_v62  ;;  %v3170_v15 = vunpack.i.l.bf16 %v3169_v62  ;;  %3453 = vrot.lane.b32.xlu0 %v4014_v7, %s3737_s20  ;;  %1889 = vmatmul.mubr.bf16.vlgmr.msra.gmra.mrb[0].mxu0 %v1697_v3  ;;  %v2891_v3 = vld [vmem:[%s3803_s10 + $0x129] sm:$0xff] }
  0x99   : > { %v1502_v16 = vsel %vm1499_vm1, %v1469_v13, %v3165_v11  ;;  %v1503_v17 = vsel %vm1499_vm1, %v1470_v14, %v3166_v10  ;;  %3458 = vrot.lane.b32.xlu1 %v3457_v61, %s3738_s21  ;;  %2945 = vmatprep.mubr.msk.bf16.mxu0 %vm1466_vm0, %v1700_v33  ;;  %v3497_v10 = vpack.i.bf16 %v2859_v53, %v2858_v52  ;;  %v2892_v52 = vld [vmem:[%s3803_s10 + $0x139] sm:$0xff]  ;;  %v2893_v53 = vld [vmem:[%s3803_s10 + $0x141] sm:$0xff] }
  0x9a   : > { %v3174_v6 = vpop.permute.xlu0 %3173  ;;  %v1535_v23 = vsel %vm1532_vm2, %v1502_v16, %v3170_v15  ;;  %v1536_v24 = vsel %vm1532_vm2, %v1503_v17, %v3171_v4  ;;  %v4097_v14 = vpack.i.bf16 %v2891_v3, %v2890_v63 }
  0x9b   : > { %v3176_v8 = vunpack.i.h.bf16 %v3174_v6  ;;  %v3175_v21 = vunpack.i.l.bf16 %v3174_v6  ;;  %v3179_v22 = vpop.permute.xlu1 %3178 }
  0x9c   : > { %v3181_v25 = vunpack.i.h.bf16 %v3179_v22  ;;  %v3180_v26 = vunpack.i.l.bf16 %v3179_v22  ;;  %3463 = vrot.lane.b32.xlu0 %v3462_v12, %s3739_s26 }
  0x9d   : > { %v1568_v27 = vsel %vm1565_vm3, %v1535_v23, %v3175_v21  ;;  %v1569_v31 = vsel %vm1565_vm3, %v1536_v24, %v3176_v8  ;;  %3468 = vrot.lane.b32.xlu1 %v4052_v18, %s3740_s27 }
  0x9e   : > { %v3184_v32 = vpop.permute.xlu0 %3183  ;;  %v1601_v30 = vsel %vm1598_vm4, %v1568_v27, %v3180_v26  ;;  %v1602_v36 = vsel %vm1598_vm4, %v1569_v31, %v3181_v25  ;;  %v4114_v27 = vld [vmem:[%s3803_s10 + $0x122] sm:$0xff]  ;;  %v4117_v31 = vld [vmem:[%s3803_s10 + $0x12a] sm:$0xff] }
  0x9f   : > { %v3186_v33 = vunpack.i.h.bf16 %v3184_v32  ;;  %v3185_v28 = vunpack.i.l.bf16 %v3184_v32  ;;  %v3189_v29 = vpop.permute.xlu1 %3188 }
  0xa0   : > { %v3191_v37 = vunpack.i.h.bf16 %v3189_v29  ;;  %v3190_v38 = vunpack.i.l.bf16 %v3189_v29  ;;  %3473 = vrot.lane.b32.xlu0 %v4014_v7, %s3734_s13 }
  0xa1   : > { %3478 = vrot.lane.b32.xlu1 %v3457_v61, %s3736_s17  ;;  %v1634_v39 = vsel %vm1631_vm5, %v1601_v30, %v3185_v28  ;;  %v1635_v40 = vsel %vm1631_vm5, %v1602_v36, %v3186_v33  ;;  %v3492_v61 = vpack.i.bf16 %v4076_v42, %v4073_v41 }
  0xa2   : > { %v3194_v49 = vpop.permute.xlu0 %3193  ;;  %v1667_v50 = vsel %vm1664_vm6, %v1634_v39, %v3190_v38  ;;  %v1668_v51 = vsel %vm1664_vm6, %v1635_v40, %v3191_v37  ;;  %v2860_v38 = vld [vmem:[%s3803_s10 + $0x138] sm:$0xff] }
  0xa3   : > { %v3196_v7 = vunpack.i.h.bf16 %v3194_v49  ;;  %v3195_v57 = vunpack.i.l.bf16 %v3194_v49  ;;  %v3199_v58 = vpop.permute.xlu1 %3198  ;;  %v1699_v43 = vpack.c.bf16 %v1668_v51, %v1667_v50  ;;  %v3527_v49 = vpack.i.bf16 %v4117_v31, %v4114_v27 }
  0xa4   : > { %v3201_v59 = vunpack.i.h.bf16 %v3199_v58  ;;  %v3200_v60 = vunpack.i.l.bf16 %v3199_v58  ;;  %3483 = vrot.lane.b32.xlu0 %v3462_v12, %s3735_s16 }
  0xa5   : > { %v1471_v5 = vsel %vm1466_vm0, %v3831_v19, %v3195_v57  ;;  %v1472_v9 = vsel %vm1466_vm0, %v3835_v20, %v3196_v7  ;;  %3488 = vrot.lane.b32.xlu1 %v4052_v18, %s3737_s20  ;;  %1897 = vmatmul.mubr.bf16.gmra.mrb[4].mxu0 %v1699_v43 }
  0xa6   : > { %v3204_v11 = vpop.permute.xlu0 %3203  ;;  %2946 = vmatprep.mubr.msk.bf16.mxu0 %vm1466_vm0, %v1702_v46  ;;  %v1504_v19 = vsel %vm1499_vm1, %v1471_v5, %v3200_v60  ;;  %v1505_v20 = vsel %vm1499_vm1, %v1472_v9, %v3201_v59  ;;  %v4140_v9 = vpack.i.bf16 %v2893_v53, %v2892_v52 }
  0xa7   : > { %v3206_v62 = vunpack.i.h.bf16 %v3204_v11  ;;  %v3205_v12 = vunpack.i.l.bf16 %v3204_v11  ;;  %v3209_v13 = vpop.permute.xlu1 %3208 }
  0xa8   : > { %v3211_v4 = vunpack.i.h.bf16 %v3209_v13  ;;  %v3210_v15 = vunpack.i.l.bf16 %v3209_v13  ;;  %3493 = vrot.lane.b32.xlu0 %v3492_v61, %s3738_s21 }
  0xa9   : > { %v1537_v16 = vsel %vm1532_vm2, %v1504_v19, %v3205_v12  ;;  %v1538_v44 = vsel %vm1532_vm2, %v1505_v20, %v3206_v62  ;;  %3498 = vrot.lane.b32.xlu1 %v3497_v10, %s3739_s26 }
  0xaa   : > { %v3214_v45 = vpop.permute.xlu0 %3213  ;;  %v1570_v8 = vsel %vm1565_vm3, %v1537_v16, %v3210_v15  ;;  %v1571_v21 = vsel %vm1565_vm3, %v1538_v44, %v3211_v4 }
  0xab   : > { %v3216_v46 = vunpack.i.h.bf16 %v3214_v45  ;;  %v3215_v17 = vunpack.i.l.bf16 %v3214_v45  ;;  %v3219_v6 = vpop.permute.xlu1 %3218 }
  0xac   : > { %v3221_v22 = vunpack.i.h.bf16 %v3219_v6  ;;  %v3220_v23 = vunpack.i.l.bf16 %v3219_v6  ;;  %3503 = vrot.lane.b32.xlu0 %v4097_v14, %s3740_s27 }
  0xad   : > { %v1603_v24 = vsel %vm1598_vm4, %v1570_v8, %v3215_v17  ;;  %v1604_v25 = vsel %vm1598_vm4, %v1571_v21, %v3216_v46  ;;  %3508 = vrot.lane.b32.xlu1 %v4052_v18, %s3734_s13  ;;  %v2861_v18 = vld [vmem:[%s3803_s10 + $0x140] sm:$0xff] }
  0xae   : > { %v3224_v26 = vpop.permute.xlu0 %3223  ;;  %v1636_v29 = vsel %vm1631_vm5, %v1603_v24, %v3220_v23  ;;  %v1637_v30 = vsel %vm1631_vm5, %v1604_v25, %v3221_v22  ;;  %v3532_v43 = vpack.i.bf16 %v2861_v18, %v2860_v38  ;;  %v4161_v8 = vld [vmem:[%s3803_s10 + $0x13a] sm:$0xff]  ;;  %v4164_v21 = vld [vmem:[%s3803_s10 + $0x142] sm:$0xff]  ;;  %v4169_v25 = vld [vmem:[%s3803_s10 + $0x150] sm:$0xff] }
  0xaf   : > { %v3226_v32 = vunpack.i.h.bf16 %v3224_v26  ;;  %v3225_v33 = vunpack.i.l.bf16 %v3224_v26  ;;  %v3229_v28 = vpop.permute.xlu1 %3228  ;;  %v2895_v38 = vld [vmem:[%s3803_s10 + $0x159] sm:$0xff] }
  0xb0   : > { %v3231_v36 = vunpack.i.h.bf16 %v3229_v28  ;;  %v3230_v37 = vunpack.i.l.bf16 %v3229_v28  ;;  %3513 = vrot.lane.b32.xlu0 %v3492_v61, %s3736_s17 }
  0xb1   : > { %3518 = vrot.lane.b32.xlu1 %v3497_v10, %s3735_s16  ;;  %v1669_v39 = vsel %vm1664_vm6, %v1636_v29, %v3225_v33  ;;  %v1670_v40 = vsel %vm1664_vm6, %v1637_v30, %v3226_v32 }
  0xb2   : > { %v3234_v50 = vpop.permute.xlu0 %3233  ;;  %v1701_v51 = vpack.c.bf16 %v1670_v40, %v1669_v39  ;;  %v1473_v59 = vsel %vm1466_vm0, %v3869_v34, %v3230_v37  ;;  %v1474_v60 = vsel %vm1466_vm0, %v3872_v35, %v3231_v36  ;;  %v3562_v36 = vpack.i.bf16 %v4164_v21, %v4161_v8  ;;  %v2894_v37 = vld [vmem:[%s3803_s10 + $0x151] sm:$0xff] }
  0xb3   : > { %v3236_v7 = vunpack.i.h.bf16 %v3234_v50  ;;  %v3235_v57 = vunpack.i.l.bf16 %v3234_v50  ;;  %v3239_v58 = vpop.permute.xlu1 %3238 }
  0xb4   : > { %v3241_v61 = vunpack.i.h.bf16 %v3239_v58  ;;  %v3240_v63 = vunpack.i.l.bf16 %v3239_v58  ;;  %3523 = vrot.lane.b32.xlu0 %v4097_v14, %s3737_s20  ;;  %1905 = vmatmul.mubr.bf16.gmra.mrb[8].mxu0 %v1701_v51 }
  0xb5   : > { %v1506_v3 = vsel %vm1499_vm1, %v1473_v59, %v3235_v57  ;;  %v1507_v5 = vsel %vm1499_vm1, %v1474_v60, %v3236_v7  ;;  %3528 = vrot.lane.b32.xlu1 %v3527_v49, %s3738_s21  ;;  %2947 = vmatprep.mubr.msk.bf16.mxu0 %vm1466_vm0, %v1704_v56 }
  0xb6   : > { %v3244_v34 = vpop.permute.xlu0 %3243  ;;  %v1539_v62 = vsel %vm1532_vm2, %v1506_v3, %v3240_v63  ;;  %v1540_v12 = vsel %vm1532_vm2, %v1507_v5, %v3241_v61 }
  0xb7   : > { %v3246_v35 = vunpack.i.h.bf16 %v3244_v34  ;;  %v3245_v10 = vunpack.i.l.bf16 %v3244_v34  ;;  %v3249_v11 = vpop.permute.xlu1 %3248 }
  0xb8   : > { %v3251_v13 = vunpack.i.h.bf16 %v3249_v11  ;;  %v3250_v19 = vunpack.i.l.bf16 %v3249_v11  ;;  %3533 = vrot.lane.b32.xlu0 %v3532_v43, %s3739_s26  ;;  %v4211_v11 = vld [vmem:[%s3803_s10 + $0x15a] sm:$0xff] }
  0xb9   : > { %v1572_v20 = vsel %vm1565_vm3, %v1539_v62, %v3245_v10  ;;  %v1573_v54 = vsel %vm1565_vm3, %v1540_v12, %v3246_v35  ;;  %3538 = vrot.lane.b32.xlu1 %v4140_v9, %s3740_s27  ;;  %v4208_v35 = vld [vmem:[%s3803_s10 + $0x152] sm:$0xff]  ;;  %v2912_v62 = vld [vmem:[%s3803_s10 + $0xaa] sm:$0xff] }
  0xba   : > { %v3254_v55 = vpop.permute.xlu0 %3253  ;;  %v1605_v16 = vsel %vm1598_vm4, %v1572_v20, %v3250_v19  ;;  %v1606_v44 = vsel %vm1598_vm4, %v1573_v54, %v3251_v13  ;;  %v2913_v12 = vld [vmem:[%s3803_s10 + $0xb2] sm:$0xff] }
  0xbb   : > { %v3256_v56 = vunpack.i.h.bf16 %v3254_v55  ;;  %v3255_v4 = vunpack.i.l.bf16 %v3254_v55  ;;  %v3259_v15 = vpop.permute.xlu1 %3258 }
  0xbc   : > { %v3261_v45 = vunpack.i.h.bf16 %v3259_v15  ;;  %v3260_v46 = vunpack.i.l.bf16 %v3259_v15  ;;  %3543 = vrot.lane.b32.xlu0 %v4097_v14, %s3734_s13  ;;  %v4172_v14 = vld [vmem:[%s3803_s10 + $0x158] sm:$0xff]  ;;  %v4222_v15 = vld [vmem:[%s3803_s10 + $0x170] sm:$0xff] }
  0xbd   : > { %v1638_v17 = vsel %vm1631_vm5, %v1605_v16, %v3255_v4  ;;  %v1639_v6 = vsel %vm1631_vm5, %v1606_v44, %v3256_v56  ;;  %3548 = vrot.lane.b32.xlu1 %v3527_v49, %s3736_s17  ;;  %v3567_v40 = vpack.i.bf16 %v4172_v14, %v4169_v25  ;;  %v4219_v4 = vld [vmem:[%s3803_s10 + $0x168] sm:$0xff]  ;;  %v290_v16 = vld [vmem:[%s3803_s10 + $0x78] sm:$0xff]  ;;  %v291_v44 = vld [vmem:[%s3803_s10 + $0x80] sm:$0xff] }
  0xbe   : > { %v3264_v22 = vpop.permute.xlu0 %3263  ;;  %v1671_v23 = vsel %vm1664_vm6, %v1638_v17, %v3260_v46  ;;  %v1672_v24 = vsel %vm1664_vm6, %v1639_v6, %v3261_v45  ;;  %v3597_v17 = vpack.i.bf16 %v4211_v11, %v4208_v35  ;;  %v1708_v6 = vpack.c.bf16 %v2913_v12, %v2912_v62  ;;  %v292_v12 = vld [vmem:[%s3803_s10 + $0x90] sm:$0xff] }
  0xbf   : > { %v3266_v26 = vunpack.i.h.bf16 %v3264_v22  ;;  %v3265_v32 = vunpack.i.l.bf16 %v3264_v22  ;;  %v3269_v33 = vpop.permute.xlu1 %3268  ;;  %v1703_v28 = vpack.c.bf16 %v1672_v24, %v1671_v23  ;;  %v2896_v24 = vld [vmem:[%s3803_s10 + $0x169] sm:$0xff] }
  0xc0   : > { %v3271_v29 = vunpack.i.h.bf16 %v3269_v33  ;;  %v3270_v30 = vunpack.i.l.bf16 %v3269_v33  ;;  %3553 = vrot.lane.b32.xlu0 %v3532_v43, %s3735_s16 }
  0xc1   : > { %v1475_v18 = vsel %vm1466_vm0, %v3905_v47, %v3265_v32  ;;  %v1476_v39 = vsel %vm1466_vm0, %v3908_v48, %v3266_v26  ;;  %3558 = vrot.lane.b32.xlu1 %v4140_v9, %s3737_s20  ;;  %1913 = vmatmul.mubr.bf16.gmra.mrb[12].mxu0 %v1703_v28  ;;  %v4191_v47 = vpack.i.bf16 %v2895_v38, %v2894_v37  ;;  %v2897_v26 = vld [vmem:[%s3803_s10 + $0x171] sm:$0xff] }
  0xc2   : > { %v3274_v49 = vpop.permute.xlu0 %3273  ;;  %2948 = vmatprep.mubr.msk.bf16.mxu0 %vm1466_vm0, %v1706_v2  ;;  %v1508_v48 = vsel %vm1499_vm1, %v1475_v18, %v3270_v30  ;;  %v1509_v53 = vsel %vm1499_vm1, %v1476_v39, %v3271_v29  ;;  %v3602_v29 = vpack.i.bf16 %v4222_v15, %v4219_v4 }
  0xc3   : > { %v3276_v50 = vunpack.i.h.bf16 %v3274_v49  ;;  %v3275_v51 = vunpack.i.l.bf16 %v3274_v49  ;;  %v3279_v52 = vpop.permute.xlu1 %3278 }
  0xc4   : > { %v3281_v7 = vunpack.i.h.bf16 %v3279_v52  ;;  %v3280_v57 = vunpack.i.l.bf16 %v3279_v52  ;;  %3563 = vrot.lane.b32.xlu0 %v3562_v36, %s3738_s21 }
  0xc5   : > { %v1541_v58 = vsel %vm1532_vm2, %v1508_v48, %v3275_v51  ;;  %v1542_v0 = vsel %vm1532_vm2, %v1509_v53, %v3276_v50  ;;  %3568 = vrot.lane.b32.xlu1 %v3567_v40, %s3739_s26 }
  0xc6   : > { %v3284_v1 = vpop.permute.xlu0 %3283  ;;  %v1574_v60 = vsel %vm1565_vm3, %v1541_v58, %v3280_v57  ;;  %v1575_v61 = vsel %vm1565_vm3, %v1542_v0, %v3281_v7 }
  0xc7   : > { %v3286_v2 = vunpack.i.h.bf16 %v3284_v1  ;;  %v3285_v43 = vunpack.i.l.bf16 %v3284_v1  ;;  %v3289_v59 = vpop.permute.xlu1 %3288 }
  0xc8   : > { %v3291_v63 = vunpack.i.h.bf16 %v3289_v59  ;;  %v3290_v3 = vunpack.i.l.bf16 %v3289_v59  ;;  %3573 = vrot.lane.b32.xlu0 %v4191_v47, %s3740_s27 }
  0xc9   : > { %v1607_v5 = vsel %vm1598_vm4, %v1574_v60, %v3285_v43  ;;  %v1608_v34 = vsel %vm1598_vm4, %v1575_v61, %v3286_v2  ;;  %3578 = vrot.lane.b32.xlu1 %v4140_v9, %s3734_s13  ;;  %v2914_v60 = vld [vmem:[%s3803_s10 + $0xc2] sm:$0xff]  ;;  %v2915_v61 = vld [vmem:[%s3803_s10 + $0xca] sm:$0xff] }
  0xca   : > { %v3294_v10 = vpop.permute.xlu0 %3293  ;;  %v1640_v54 = vsel %vm1631_vm5, %v1607_v5, %v3290_v3  ;;  %v1641_v55 = vsel %vm1631_vm5, %v1608_v34, %v3291_v63 }
  0xcb   : > { %v3296_v13 = vunpack.i.h.bf16 %v3294_v10  ;;  %v3295_v19 = vunpack.i.l.bf16 %v3294_v10  ;;  %v3299_v20 = vpop.permute.xlu1 %3298 }
  0xcc   : > { %v3301_v56 = vunpack.i.h.bf16 %v3299_v20  ;;  %v3300_v9 = vunpack.i.l.bf16 %v3299_v20  ;;  %3583 = vrot.lane.b32.xlu0 %v3562_v36, %s3736_s17 }
  0xcd   : > { %3588 = vrot.lane.b32.xlu1 %v3567_v40, %s3735_s16  ;;  %v1673_v45 = vsel %vm1664_vm6, %v1640_v54, %v3295_v19  ;;  %v1674_v46 = vsel %vm1664_vm6, %v1641_v55, %v3296_v13  ;;  %v4242_v40 = vpack.i.bf16 %v2897_v26, %v2896_v24  ;;  %v4263_v13 = vld [vmem:[%s3803_s10 + $0x16a] sm:$0xff]  ;;  %v4266_v19 = vld [vmem:[%s3803_s10 + $0x172] sm:$0xff]  ;;  %v2898_v24 = vld [vmem:[%s3803_s10 + $0x181] sm:$0xff] }
  0xce   : > { %v3304_v22 = vpop.permute.xlu0 %3303  ;;  %v1705_v23 = vpack.c.bf16 %v1674_v46, %v1673_v45  ;;  %v1477_v30 = vsel %vm1466_vm0, %v290_v16, %v3300_v9  ;;  %v1478_v36 = vsel %vm1466_vm0, %v291_v44, %v3301_v56  ;;  %v293_v54 = vld [vmem:[%s3803_s10 + $0x98] sm:$0xff]  ;;  %v2867_v9 = vld [vmem:[%s3803_s10 + $0x188] sm:$0xff]  ;;  %v1710_v16 = vpack.c.bf16 %v2915_v61, %v2914_v60 }
  0xcf   : > { %v3306_v32 = vunpack.i.h.bf16 %v3304_v22  ;;  %v3305_v33 = vunpack.i.l.bf16 %v3304_v22  ;;  %v3309_v28 = vpop.permute.xlu1 %3308  ;;  %v2899_v26 = vld [vmem:[%s3803_s10 + $0x189] sm:$0xff] }
  0xd0   : > { %v3311_v37 = vunpack.i.h.bf16 %v3309_v28  ;;  %v3310_v38 = vunpack.i.l.bf16 %v3309_v28  ;;  %3593 = vrot.lane.b32.xlu0 %v4191_v47, %s3737_s20  ;;  %1921 = vmatmul.mubr.bf16.gmra.mrb[16].mxu0 %v1705_v23  ;;  %v3632_v23 = vpack.i.bf16 %v4266_v19, %v4263_v13  ;;  %v4297_v60 = vld [vmem:[%s3803_s10 + $0x182] sm:$0xff] }
  0xd1   : > { %v1510_v18 = vsel %vm1499_vm1, %v1477_v30, %v3305_v33  ;;  %v1511_v39 = vsel %vm1499_vm1, %v1478_v36, %v3306_v32  ;;  %3598 = vrot.lane.b32.xlu1 %v3597_v17, %s3738_s21  ;;  %2949 = vmatprep.mubr.msk.bf16.mxu0 %vm1466_vm0, %v1708_v6 }
  0xd2   : > { %v3314_v49 = vpop.permute.xlu0 %3313  ;;  %v1543_v48 = vsel %vm1532_vm2, %v1510_v18, %v3310_v38  ;;  %v1544_v53 = vsel %vm1532_vm2, %v1511_v39, %v3311_v37  ;;  %v3642_v38 = vpack.i.bf16 %v2899_v26, %v2898_v24  ;;  %v2901_v24 = vld [vmem:[%s3803_s10 + $0x1a1] sm:$0xff] }
  0xd3   : > { %v3316_v50 = vunpack.i.h.bf16 %v3314_v49  ;;  %v3315_v51 = vunpack.i.l.bf16 %v3314_v49  ;;  %v3319_v52 = vpop.permute.xlu1 %3318 }
  0xd4   : > { %v3321_v7 = vunpack.i.h.bf16 %v3319_v52  ;;  %v3320_v57 = vunpack.i.l.bf16 %v3319_v52  ;;  %3603 = vrot.lane.b32.xlu0 %v3602_v29, %s3739_s26 }
  0xd5   : > { %v1576_v58 = vsel %vm1565_vm3, %v1543_v48, %v3315_v51  ;;  %v1577_v0 = vsel %vm1565_vm3, %v1544_v53, %v3316_v50  ;;  %3608 = vrot.lane.b32.xlu1 %v4242_v40, %s3740_s27 }
  0xd6   : > { %v3324_v1 = vpop.permute.xlu0 %3323  ;;  %v1609_v63 = vsel %vm1598_vm4, %v1576_v58, %v3320_v57  ;;  %v1610_v3 = vsel %vm1598_vm4, %v1577_v0, %v3321_v7 }
  0xd7   : > { %v3326_v2 = vunpack.i.h.bf16 %v3324_v1  ;;  %v3325_v43 = vunpack.i.l.bf16 %v3324_v1  ;;  %v3329_v59 = vpop.permute.xlu1 %3328 }
  0xd8   : > { %v3331_v5 = vunpack.i.h.bf16 %v3329_v59  ;;  %v3330_v34 = vunpack.i.l.bf16 %v3329_v59  ;;  %3613 = vrot.lane.b32.xlu0 %v4191_v47, %s3734_s13  ;;  %v2866_v47 = vld [vmem:[%s3803_s10 + $0x180] sm:$0xff] }
  0xd9   : > { %v1642_v10 = vsel %vm1631_vm5, %v1609_v63, %v3325_v43  ;;  %v1643_v62 = vsel %vm1631_vm5, %v1610_v3, %v3326_v2  ;;  %3618 = vrot.lane.b32.xlu1 %v3597_v17, %s3736_s17  ;;  %v3637_v28 = vpack.i.bf16 %v2867_v9, %v2866_v47  ;;  %v4300_v63 = vld [vmem:[%s3803_s10 + $0x18a] sm:$0xff]  ;;  %v2916_v3 = vld [vmem:[%s3803_s10 + $0xda] sm:$0xff] }
  0xda   : > { %v3334_v20 = vpop.permute.xlu0 %3333  ;;  %v1675_v55 = vsel %vm1664_vm6, %v1642_v10, %v3330_v34  ;;  %v1676_v56 = vsel %vm1664_vm6, %v1643_v62, %v3331_v5  ;;  %v2917_v5 = vld [vmem:[%s3803_s10 + $0xe2] sm:$0xff]  ;;  %v295_v9 = vld [vmem:[%s3803_s10 + $0xb0] sm:$0xff] }
  0xdb   : > { %v3336_v44 = vunpack.i.h.bf16 %v3334_v20  ;;  %v3335_v45 = vunpack.i.l.bf16 %v3334_v20  ;;  %v3339_v46 = vpop.permute.xlu1 %3338  ;;  %v1707_v17 = vpack.c.bf16 %v1676_v56, %v1675_v55  ;;  %v2868_v55 = vld [vmem:[%s3803_s10 + $0x198] sm:$0xff]  ;;  %v2869_v56 = vld [vmem:[%s3803_s10 + $0x1a0] sm:$0xff]  ;;  %v294_v47 = vld [vmem:[%s3803_s10 + $0xa8] sm:$0xff] }
  0xdc   : > { %v3341_v6 = vunpack.i.h.bf16 %v3339_v46  ;;  %v3340_v22 = vunpack.i.l.bf16 %v3339_v46  ;;  %3623 = vrot.lane.b32.xlu0 %v3602_v29, %s3735_s16  ;;  %v1712_v46 = vpack.c.bf16 %v2917_v5, %v2916_v3 }
  0xdd   : > { %v1479_v32 = vsel %vm1466_vm0, %v292_v12, %v3335_v45  ;;  %v1480_v33 = vsel %vm1466_vm0, %v293_v54, %v3336_v44  ;;  %3628 = vrot.lane.b32.xlu1 %v4242_v40, %s3737_s20  ;;  %1929 = vmatmul.mubr.bf16.gmra.mrb[20].mxu0 %v1707_v17  ;;  %v3667_v45 = vpack.i.bf16 %v4300_v63, %v4297_v60 }
  0xde   : > { %v3344_v30 = vpop.permute.xlu0 %3343  ;;  %2950 = vmatprep.mubr.msk.bf16.mxu0 %vm1466_vm0, %v1710_v16  ;;  %v1512_v18 = vsel %vm1499_vm1, %v1479_v32, %v3340_v22  ;;  %v1513_v39 = vsel %vm1499_vm1, %v1480_v33, %v3341_v6  ;;  %v2900_v22 = vld [vmem:[%s3803_s10 + $0x199] sm:$0xff]  ;;  %v3672_v33 = vpack.i.bf16 %v2869_v56, %v2868_v55 }
  0xdf   : > { %v3346_v36 = vunpack.i.h.bf16 %v3344_v30  ;;  %v3345_v37 = vunpack.i.l.bf16 %v3344_v30  ;;  %v3349_v29 = vpop.permute.xlu1 %3348 }
  0xe0   : > { %v3351_v49 = vunpack.i.h.bf16 %v3349_v29  ;;  %v3350_v50 = vunpack.i.l.bf16 %v3349_v29  ;;  %3633 = vrot.lane.b32.xlu0 %v3632_v23, %s3738_s21 }
  0xe1   : > { %v1545_v51 = vsel %vm1532_vm2, %v1512_v18, %v3345_v37  ;;  %v1546_v52 = vsel %vm1532_vm2, %v1513_v39, %v3346_v36  ;;  %3638 = vrot.lane.b32.xlu1 %v3637_v28, %s3739_s26  ;;  %v3677_v39 = vpack.i.bf16 %v2901_v24, %v2900_v22 }
  0xe2   : > { %v3354_v48 = vpop.permute.xlu0 %3353  ;;  %v1578_v58 = vsel %vm1565_vm3, %v1545_v51, %v3350_v50  ;;  %v1579_v0 = vsel %vm1565_vm3, %v1546_v52, %v3351_v49 }
  0xe3   : > { %v3356_v53 = vunpack.i.h.bf16 %v3354_v48  ;;  %v3355_v7 = vunpack.i.l.bf16 %v3354_v48  ;;  %v3359_v57 = vpop.permute.xlu1 %3358 }
  0xe4   : > { %v3361_v1 = vunpack.i.h.bf16 %v3359_v57  ;;  %v3360_v2 = vunpack.i.l.bf16 %v3359_v57  ;;  %3643 = vrot.lane.b32.xlu0 %v3642_v38, %s3740_s27 }
  0xe5   : > { %v1611_v43 = vsel %vm1598_vm4, %v1578_v58, %v3355_v7  ;;  %v1612_v59 = vsel %vm1598_vm4, %v1579_v0, %v3356_v53  ;;  %3648 = vrot.lane.b32.xlu1 %v4242_v40, %s3734_s13 }
  0xe6   : > { %v3364_v61 = vpop.permute.xlu0 %3363  ;;  %v1644_v12 = vsel %vm1631_vm5, %v1611_v43, %v3360_v2  ;;  %v1645_v20 = vsel %vm1631_vm5, %v1612_v59, %v3361_v1  ;;  %v2918_v59 = vld [vmem:[%s3803_s10 + $0xf2] sm:$0xff] }
  0xe7   : > { %v3366_v34 = vunpack.i.h.bf16 %v3364_v61  ;;  %v3365_v10 = vunpack.i.l.bf16 %v3364_v61  ;;  %v3369_v62 = vpop.permute.xlu1 %3368  ;;  %v2919_v61 = vld [vmem:[%s3803_s10 + $0xfa] sm:$0xff] }
  0xe8   : > { %v3371_v54 = vunpack.i.h.bf16 %v3369_v62  ;;  %v3370_v40 = vunpack.i.l.bf16 %v3369_v62  ;;  %3653 = vrot.lane.b32.xlu0 %v3632_v23, %s3736_s17 }
  0xe9   : > { %3658 = vrot.lane.b32.xlu1 %v3637_v28, %s3735_s16  ;;  %v1677_v16 = vsel %vm1664_vm6, %v1644_v12, %v3365_v10  ;;  %v1678_v44 = vsel %vm1664_vm6, %v1645_v20, %v3366_v34 }
  0xea   : > { %v3374_v17 = vpop.permute.xlu0 %3373  ;;  %v1709_v6 = vpack.c.bf16 %v1678_v44, %v1677_v16  ;;  %v1481_v30 = vsel %vm1466_vm0, %v294_v47, %v3370_v40  ;;  %v1482_v28 = vsel %vm1466_vm0, %v295_v9, %v3371_v54  ;;  %v296_v54 = vld [vmem:[%s3803_s10 + $0xc0] sm:$0xff]  ;;  %v297_v40 = vld [vmem:[%s3803_s10 + $0xc8] sm:$0xff]  ;;  %v1714_v47 = vpack.c.bf16 %v2919_v61, %v2918_v59 }
  0xeb   : > { %v3376_v26 = vunpack.i.h.bf16 %v3374_v17  ;;  %v3375_v23 = vunpack.i.l.bf16 %v3374_v17  ;;  %v3379_v32 = vpop.permute.xlu1 %3378 }
  0xec   : > { %v3381_v36 = vunpack.i.h.bf16 %v3379_v32  ;;  %v3380_v37 = vunpack.i.l.bf16 %v3379_v32  ;;  %3663 = vrot.lane.b32.xlu0 %v3642_v38, %s3737_s20  ;;  %1937 = vmatmul.mubr.bf16.gmra.mrb[24].mxu0 %v1709_v6 }
  0xed   : > { %v1514_v29 = vsel %vm1499_vm1, %v1481_v30, %v3375_v23  ;;  %v1515_v18 = vsel %vm1499_vm1, %v1482_v28, %v3376_v26  ;;  %3668 = vrot.lane.b32.xlu1 %v3667_v45, %s3738_s21  ;;  %2951 = vmatprep.mubr.msk.bf16.mxu0 %vm1466_vm0, %v1712_v46 }
  0xee   : > { %v3384_v49 = vpop.permute.xlu0 %3383  ;;  %v1547_v48 = vsel %vm1532_vm2, %v1514_v29, %v3380_v37  ;;  %v1548_v38 = vsel %vm1532_vm2, %v1515_v18, %v3381_v36  ;;  %v2065_v37 = vld [vmem:[%s4661_s3] sm:$0xf] }
  0xef   : > { %v3386_v50 = vunpack.i.h.bf16 %v3384_v49  ;;  %v3385_v51 = vunpack.i.l.bf16 %v3384_v49  ;;  %v3389_v52 = vpop.permute.xlu1 %3388  ;;  %3104 = vmatprep.subr.msk.bf16.mxu1 %vm2122_vm7, %v2065_v37 }
  0xf0   : > { %v3391_v53 = vunpack.i.h.bf16 %v3389_v52  ;;  %v3390_v7 = vunpack.i.l.bf16 %v3389_v52  ;;  %3673 = vrot.lane.b32.xlu0 %v3672_v33, %s3739_s26 }
  0xf1   : > { %v1580_v57 = vsel %vm1565_vm3, %v1547_v48, %v3385_v51  ;;  %v1581_v58 = vsel %vm1565_vm3, %v1548_v38, %v3386_v50  ;;  %3678 = vrot.lane.b32.xlu1 %v3677_v39, %s3740_s27  ;;  %v2124_v39 = vsel %vm2122_vm7, %v2065_v37, 0 }
  0xf2   : > { %v3394_v0 = vpop.permute.xlu0 %3393  ;;  %v1613_v3 = vsel %vm1598_vm4, %v1580_v57, %v3390_v7  ;;  %v1614_v5 = vsel %vm1598_vm4, %v1581_v58, %v3391_v53  ;;  %3035 = vmatpush3.bf16.msra.mxu1 %v2124_v39 }
  0xf3   : > { %v3396_v1 = vunpack.i.h.bf16 %v3394_v0  ;;  %v3395_v2 = vunpack.i.l.bf16 %v3394_v0  ;;  %v3399_v43 = vpop.permute.xlu1 %3398 }
  0xf4   : > { %v3401_v34 = vunpack.i.h.bf16 %v3399_v43  ;;  %v3400_v10 = vunpack.i.l.bf16 %v3399_v43 }
  0xf5   : > { %v1646_v62 = vsel %vm1631_vm5, %v1613_v3, %v3395_v2  ;;  %v1647_v12 = vsel %vm1631_vm5, %v1614_v5, %v3396_v1 }
  0xf6   : > { %v3404_v20 = vpop.permute.xlu0 %3403  ;;  %v1679_v55 = vsel %vm1664_vm6, %v1646_v62, %v3400_v10  ;;  %v1680_v56 = vsel %vm1664_vm6, %v1647_v12, %v3401_v34  ;;  %v298_v34 = vld [vmem:[%s3803_s10 + $0xd8] sm:$0xff]  ;;  %v299_v10 = vld [vmem:[%s3803_s10 + $0xe0] sm:$0xff] }
  0xf7   : > { %v3406_v9 = vunpack.i.h.bf16 %v3404_v20  ;;  %v3405_v16 = vunpack.i.l.bf16 %v3404_v20  ;;  %v3409_v44 = vpop.permute.xlu1 %3408  ;;  %v1711_v45 = vpack.c.bf16 %v1680_v56, %v1679_v55  ;;  %v1716_v20 = vpack.c.bf16 %v4076_v42, %v4073_v41 }
  0xf8   : > { %v3411_v46 = vunpack.i.h.bf16 %v3409_v44  ;;  %v3410_v17 = vunpack.i.l.bf16 %v3409_v44 }
  0xf9   : > { %v1483_v6 = vsel %vm1466_vm0, %v296_v54, %v3405_v16  ;;  %v1484_v22 = vsel %vm1466_vm0, %v297_v40, %v3406_v9  ;;  %1945 = vmatmul.mubr.bf16.gmra.mrb[28].mxu0 %v1711_v45 }
  0xfa   : > { %v3414_v24 = vpop.permute.xlu0 %3413  ;;  %2952 = vmatprep.mubr.msk.bf16.mxu0 %vm1466_vm0, %v1714_v47  ;;  %v1516_v26 = vsel %vm1499_vm1, %v1483_v6, %v3410_v17  ;;  %v1517_v30 = vsel %vm1499_vm1, %v1484_v22, %v3411_v46 }
  0xfb   : > { %v3416_v23 = vunpack.i.h.bf16 %v3414_v24  ;;  %v3415_v32 = vunpack.i.l.bf16 %v3414_v24  ;;  %v3419_v33 = vpop.permute.xlu1 %3418 }
  0xfc   : > { %v3421_v28 = vunpack.i.h.bf16 %v3419_v33  ;;  %v3420_v36 = vunpack.i.l.bf16 %v3419_v33 }
  0xfd   : > { %v1549_v29 = vsel %vm1532_vm2, %v1516_v26, %v3415_v32  ;;  %v1550_v18 = vsel %vm1532_vm2, %v1517_v30, %v3416_v23 }
  0xfe   : > { %v3424_v49 = vpop.permute.xlu0 %3423  ;;  %v1582_v48 = vsel %vm1565_vm3, %v1549_v29, %v3420_v36  ;;  %v1583_v38 = vsel %vm1565_vm3, %v1550_v18, %v3421_v28 }
  0xff   : > { %v3426_v50 = vunpack.i.h.bf16 %v3424_v49  ;;  %v3425_v51 = vunpack.i.l.bf16 %v3424_v49  ;;  %v3429_v52 = vpop.permute.xlu1 %3428 }
 0x100   : > { %v3431_v53 = vunpack.i.h.bf16 %v3429_v52  ;;  %v3430_v7 = vunpack.i.l.bf16 %v3429_v52 }
 0x101   : > { %v1615_v57 = vsel %vm1598_vm4, %v1582_v48, %v3425_v51  ;;  %v1616_v58 = vsel %vm1598_vm4, %v1583_v38, %v3426_v50  ;;  %v300_v38 = vld [vmem:[%s3803_s10 + $0xf0] sm:$0xff] }
 0x102   : > { %v3434_v0 = vpop.permute.xlu0 %3433  ;;  %v1648_v59 = vsel %vm1631_vm5, %v1615_v57, %v3430_v7  ;;  %v1649_v61 = vsel %vm1631_vm5, %v1616_v58, %v3431_v53  ;;  %v301_v53 = vld [vmem:[%s3803_s10 + $0xf8] sm:$0xff]  ;;  %v1718_v58 = vpack.c.bf16 %v4117_v31, %v4114_v27 }
 0x103   : > { %v3436_v1 = vunpack.i.h.bf16 %v3434_v0  ;;  %v3435_v2 = vunpack.i.l.bf16 %v3434_v0  ;;  %v3439_v43 = vpop.permute.xlu1 %3438 }
 0x104   : > { %v3441_v3 = vunpack.i.h.bf16 %v3439_v43  ;;  %v3440_v5 = vunpack.i.l.bf16 %v3439_v43 }
 0x105   : > { %v1681_v62 = vsel %vm1664_vm6, %v1648_v59, %v3435_v2  ;;  %v1682_v12 = vsel %vm1664_vm6, %v1649_v61, %v3436_v1 }
 0x106   : > { %v3444_v54 = vpop.permute.xlu0 %3443  ;;  %v1713_v40 = vpack.c.bf16 %v1682_v12, %v1681_v62  ;;  %v1485_v9 = vsel %vm1466_vm0, %v298_v34, %v3440_v5  ;;  %v1486_v16 = vsel %vm1466_vm0, %v299_v10, %v3441_v3 }
 0x107   : > { %v3446_v55 = vunpack.i.h.bf16 %v3444_v54  ;;  %v3445_v56 = vunpack.i.l.bf16 %v3444_v54  ;;  %v3449_v47 = vpop.permute.xlu1 %3448 }
 0x108   : > { %v3451_v44 = vunpack.i.h.bf16 %v3449_v47  ;;  %v3450_v45 = vunpack.i.l.bf16 %v3449_v47  ;;  %1953 = vmatmul.mubr.bf16.gmra.mrb[32].mxu0 %v1713_v40 }
 0x109   : > { %v1518_v46 = vsel %vm1499_vm1, %v1485_v9, %v3445_v56  ;;  %v1519_v17 = vsel %vm1499_vm1, %v1486_v16, %v3446_v55  ;;  %2953 = vmatprep.mubr.msk.bf16.mxu0 %vm1466_vm0, %v1716_v20 }
 0x10a   : > { %v3454_v6 = vpop.permute.xlu0 %3453  ;;  %v1551_v24 = vsel %vm1532_vm2, %v1518_v46, %v3450_v45  ;;  %v1552_v26 = vsel %vm1532_vm2, %v1519_v17, %v3451_v44 }
 0x10b   : > { %v3456_v41 = vunpack.i.h.bf16 %v3454_v6  ;;  %v3455_v42 = vunpack.i.l.bf16 %v3454_v6  ;;  %v3459_v22 = vpop.permute.xlu1 %3458 }
 0x10c   : > { %v3461_v23 = vunpack.i.h.bf16 %v3459_v22  ;;  %v3460_v32 = vunpack.i.l.bf16 %v3459_v22 }
 0x10d   : > { %v1584_v33 = vsel %vm1565_vm3, %v1551_v24, %v3455_v42  ;;  %v1585_v30 = vsel %vm1565_vm3, %v1552_v26, %v3456_v41 }
 0x10e   : > { %v3464_v28 = vpop.permute.xlu0 %3463  ;;  %v1617_v18 = vsel %vm1598_vm4, %v1584_v33, %v3460_v32  ;;  %v1618_v39 = vsel %vm1598_vm4, %v1585_v30, %v3461_v23 }
 0x10f   : > { %v3466_v36 = vunpack.i.h.bf16 %v3464_v28  ;;  %v3465_v37 = vunpack.i.l.bf16 %v3464_v28  ;;  %v3469_v29 = vpop.permute.xlu1 %3468  ;;  %v302_v28 = vld [vmem:[%s3803_s10 + $0x108] sm:$0xff] }
 0x110   : > { %v3471_v49 = vunpack.i.h.bf16 %v3469_v29  ;;  %v3470_v50 = vunpack.i.l.bf16 %v3469_v29 }
 0x111   : > { %v1650_v51 = vsel %vm1631_vm5, %v1617_v18, %v3465_v37  ;;  %v1651_v52 = vsel %vm1631_vm5, %v1618_v39, %v3466_v36  ;;  %v303_v36 = vld [vmem:[%s3803_s10 + $0x110] sm:$0xff]  ;;  %v1720_v18 = vpack.c.bf16 %v4164_v21, %v4161_v8 }
 0x112   : > { %v3474_v48 = vpop.permute.xlu0 %3473  ;;  %v1683_v7 = vsel %vm1664_vm6, %v1650_v51, %v3470_v50  ;;  %v1684_v57 = vsel %vm1664_vm6, %v1651_v52, %v3471_v49 }
 0x113   : > { %v3476_v0 = vunpack.i.h.bf16 %v3474_v48  ;;  %v3475_v1 = vunpack.i.l.bf16 %v3474_v48  ;;  %v3479_v2 = vpop.permute.xlu1 %3478  ;;  %v1715_v43 = vpack.c.bf16 %v1684_v57, %v1683_v7 }
 0x114   : > { %v3481_v59 = vunpack.i.h.bf16 %v3479_v2  ;;  %v3480_v61 = vunpack.i.l.bf16 %v3479_v2 }
 0x115   : > { %v1487_v3 = vsel %vm1466_vm0, %v300_v38, %v3475_v1  ;;  %v1488_v5 = vsel %vm1466_vm0, %v301_v53, %v3476_v0  ;;  %1961 = vmatmul.mubr.bf16.gmra.mrb[36].mxu0 %v1715_v43 }
 0x116   : > { %v3484_v34 = vpop.permute.xlu0 %3483  ;;  %2954 = vmatprep.mubr.msk.bf16.mxu0 %vm1466_vm0, %v1718_v58  ;;  %v1520_v20 = vsel %vm1499_vm1, %v1487_v3, %v3480_v61  ;;  %v1521_v27 = vsel %vm1499_vm1, %v1488_v5, %v3481_v59 }
 0x117   : > { %v3486_v10 = vunpack.i.h.bf16 %v3484_v34  ;;  %v3485_v62 = vunpack.i.l.bf16 %v3484_v34  ;;  %v3489_v12 = vpop.permute.xlu1 %3488 }
 0x118   : > { %v3491_v31 = vunpack.i.h.bf16 %v3489_v12  ;;  %v3490_v54 = vunpack.i.l.bf16 %v3489_v12 }
 0x119   : > { %v1553_v40 = vsel %vm1532_vm2, %v1520_v20, %v3485_v62  ;;  %v1554_v55 = vsel %vm1532_vm2, %v1521_v27, %v3486_v10 }
 0x11a   : > { %v3494_v56 = vpop.permute.xlu0 %3493  ;;  %v1586_v44 = vsel %vm1565_vm3, %v1553_v40, %v3490_v54  ;;  %v1587_v45 = vsel %vm1565_vm3, %v1554_v55, %v3491_v31 }
 0x11b   : > { %v3496_v47 = vunpack.i.h.bf16 %v3494_v56  ;;  %v3495_v9 = vunpack.i.l.bf16 %v3494_v56  ;;  %v3499_v16 = vpop.permute.xlu1 %3498 }
 0x11c   : > { %v3501_v46 = vunpack.i.h.bf16 %v3499_v16  ;;  %v3500_v17 = vunpack.i.l.bf16 %v3499_v16 }
 0x11d   : > { %v1619_v6 = vsel %vm1598_vm4, %v1586_v44, %v3495_v9  ;;  %v1620_v41 = vsel %vm1598_vm4, %v1587_v45, %v3496_v47  ;;  %v304_v47 = vld [vmem:[%s3803_s10 + $0x120] sm:$0xff]  ;;  %v305_v9 = vld [vmem:[%s3803_s10 + $0x128] sm:$0xff]  ;;  %v1722_v45 = vpack.c.bf16 %v4211_v11, %v4208_v35 }
 0x11e   : > { %v3504_v42 = vpop.permute.xlu0 %3503  ;;  %v1652_v23 = vsel %vm1631_vm5, %v1619_v6, %v3500_v17  ;;  %v1653_v32 = vsel %vm1631_vm5, %v1620_v41, %v3501_v46 }
 0x11f   : > { %v3506_v22 = vunpack.i.h.bf16 %v3504_v42  ;;  %v3505_v24 = vunpack.i.l.bf16 %v3504_v42  ;;  %v3509_v26 = vpop.permute.xlu1 %3508 }
 0x120   : > { %v3511_v33 = vunpack.i.h.bf16 %v3509_v26  ;;  %v3510_v30 = vunpack.i.l.bf16 %v3509_v26 }
 0x121   : > { %v1685_v37 = vsel %vm1664_vm6, %v1652_v23, %v3505_v24  ;;  %v1686_v29 = vsel %vm1664_vm6, %v1653_v32, %v3506_v22 }
 0x122   : > { %v3514_v39 = vpop.permute.xlu0 %3513  ;;  %v1717_v49 = vpack.c.bf16 %v1686_v29, %v1685_v37  ;;  %v1489_v48 = vsel %vm1466_vm0, %v302_v28, %v3510_v30  ;;  %v1490_v38 = vsel %vm1466_vm0, %v303_v36, %v3511_v33 }
 0x123   : > { %v3516_v50 = vunpack.i.h.bf16 %v3514_v39  ;;  %v3515_v51 = vunpack.i.l.bf16 %v3514_v39  ;;  %v3519_v52 = vpop.permute.xlu1 %3518 }
 0x124   : > { %v3521_v53 = vunpack.i.h.bf16 %v3519_v52  ;;  %v3520_v7 = vunpack.i.l.bf16 %v3519_v52  ;;  %1969 = vmatmul.mubr.bf16.gmra.mrb[40].mxu0 %v1717_v49 }
 0x125   : > { %v1522_v57 = vsel %vm1499_vm1, %v1489_v48, %v3515_v51  ;;  %v1523_v58 = vsel %vm1499_vm1, %v1490_v38, %v3516_v50  ;;  %2955 = vmatprep.mubr.msk.bf16.mxu0 %vm1466_vm0, %v1720_v18 }
 0x126   : > { %v3524_v0 = vpop.permute.xlu0 %3523  ;;  %v1555_v2 = vsel %vm1532_vm2, %v1522_v57, %v3520_v7  ;;  %v1556_v43 = vsel %vm1532_vm2, %v1523_v58, %v3521_v53 }
 0x127   : > { %v3526_v8 = vunpack.i.h.bf16 %v3524_v0  ;;  %v3525_v21 = vunpack.i.l.bf16 %v3524_v0  ;;  %v3529_v1 = vpop.permute.xlu1 %3528 }
 0x128   : > { %v3531_v59 = vunpack.i.h.bf16 %v3529_v1  ;;  %v3530_v61 = vunpack.i.l.bf16 %v3529_v1 }
 0x129   : > { %v1588_v3 = vsel %vm1565_vm3, %v1555_v2, %v3525_v21  ;;  %v1589_v5 = vsel %vm1565_vm3, %v1556_v43, %v3526_v8 }
 0x12a   : > { %v3534_v34 = vpop.permute.xlu0 %3533  ;;  %v1621_v20 = vsel %vm1598_vm4, %v1588_v3, %v3530_v61  ;;  %v1622_v27 = vsel %vm1598_vm4, %v1589_v5, %v3531_v59  ;;  %v306_v59 = vld [vmem:[%s3803_s10 + $0x138] sm:$0xff]  ;;  %v307_v61 = vld [vmem:[%s3803_s10 + $0x140] sm:$0xff] }
 0x12b   : > { %v3536_v10 = vunpack.i.h.bf16 %v3534_v34  ;;  %v3535_v62 = vunpack.i.l.bf16 %v3534_v34  ;;  %v3539_v12 = vpop.permute.xlu1 %3538  ;;  %v1724_v34 = vpack.c.bf16 %v4266_v19, %v4263_v13 }
 0x12c   : > { %v3541_v31 = vunpack.i.h.bf16 %v3539_v12  ;;  %v3540_v54 = vunpack.i.l.bf16 %v3539_v12 }
 0x12d   : > { %v1654_v40 = vsel %vm1631_vm5, %v1621_v20, %v3535_v62  ;;  %v1655_v55 = vsel %vm1631_vm5, %v1622_v27, %v3536_v10 }
 0x12e   : > { %v3544_v56 = vpop.permute.xlu0 %3543  ;;  %v1687_v16 = vsel %vm1664_vm6, %v1654_v40, %v3540_v54  ;;  %v1688_v44 = vsel %vm1664_vm6, %v1655_v55, %v3541_v31 }
 0x12f   : > { %v3546_v46 = vunpack.i.h.bf16 %v3544_v56  ;;  %v3545_v17 = vunpack.i.l.bf16 %v3544_v56  ;;  %v3549_v6 = vpop.permute.xlu1 %3548  ;;  %v1719_v41 = vpack.c.bf16 %v1688_v44, %v1687_v16 }
 0x130   : > { %v3551_v42 = vunpack.i.h.bf16 %v3549_v6  ;;  %v3550_v22 = vunpack.i.l.bf16 %v3549_v6 }
 0x131   : > { %v1491_v24 = vsel %vm1466_vm0, %v304_v47, %v3545_v17  ;;  %v1492_v26 = vsel %vm1466_vm0, %v305_v9, %v3546_v46  ;;  %1977 = vmatmul.mubr.bf16.gmra.mrb[44].mxu0 %v1719_v41 }
 0x132   : > { %v3554_v23 = vpop.permute.xlu0 %3553  ;;  %2956 = vmatprep.mubr.msk.bf16.mxu0 %vm1466_vm0, %v1722_v45  ;;  %v1524_v28 = vsel %vm1499_vm1, %v1491_v24, %v3550_v22  ;;  %v1525_v35 = vsel %vm1499_vm1, %v1492_v26, %v3551_v42 }
 0x133   : > { %v3556_v32 = vunpack.i.h.bf16 %v3554_v23  ;;  %v3555_v33 = vunpack.i.l.bf16 %v3554_v23  ;;  %v3559_v30 = vpop.permute.xlu1 %3558 }
 0x134   : > { %v3561_v11 = vunpack.i.h.bf16 %v3559_v30  ;;  %v3560_v36 = vunpack.i.l.bf16 %v3559_v30 }
 0x135   : > { %v1557_v37 = vsel %vm1532_vm2, %v1524_v28, %v3555_v33  ;;  %v1558_v29 = vsel %vm1532_vm2, %v1525_v35, %v3556_v32 }
 0x136   : > { %v3564_v18 = vpop.permute.xlu0 %3563  ;;  %v1590_v51 = vsel %vm1565_vm3, %v1557_v37, %v3560_v36  ;;  %v1591_v52 = vsel %vm1565_vm3, %v1558_v29, %v3561_v11  ;;  %v1726_v29 = vpack.c.bf16 %v4300_v63, %v4297_v60 }
 0x137   : > { %v3566_v39 = vunpack.i.h.bf16 %v3564_v18  ;;  %v3565_v49 = vunpack.i.l.bf16 %v3564_v18  ;;  %v3569_v50 = vpop.permute.xlu1 %3568 }
 0x138   : > { %v3571_v48 = vunpack.i.h.bf16 %v3569_v50  ;;  %v3570_v38 = vunpack.i.l.bf16 %v3569_v50 }
 0x139   : > { %v1623_v53 = vsel %vm1598_vm4, %v1590_v51, %v3565_v49  ;;  %v1624_v7 = vsel %vm1598_vm4, %v1591_v52, %v3566_v39 }
 0x13a   : > { %v3574_v57 = vpop.permute.xlu0 %3573  ;;  %v1656_v21 = vsel %vm1631_vm5, %v1623_v53, %v3570_v38  ;;  %v1657_v1 = vsel %vm1631_vm5, %v1624_v7, %v3571_v48 }
 0x13b   : > { %v3576_v58 = vunpack.i.h.bf16 %v3574_v57  ;;  %v3575_v0 = vunpack.i.l.bf16 %v3574_v57  ;;  %v3579_v8 = vpop.permute.xlu1 %3578 }
 0x13c   : > { %v3581_v2 = vunpack.i.h.bf16 %v3579_v8  ;;  %v3580_v43 = vunpack.i.l.bf16 %v3579_v8 }
 0x13d   : > { %v1689_v3 = vsel %vm1664_vm6, %v1656_v21, %v3575_v0  ;;  %v1690_v5 = vsel %vm1664_vm6, %v1657_v1, %v3576_v58 }
 0x13e   : > { %v3584_v10 = vpop.permute.xlu0 %3583  ;;  %v1721_v62 = vpack.c.bf16 %v1690_v5, %v1689_v3  ;;  %v1493_v31 = vsel %vm1466_vm0, %v306_v59, %v3580_v43  ;;  %v1494_v54 = vsel %vm1466_vm0, %v307_v61, %v3581_v2 }
 0x13f   : > { %v3586_v12 = vunpack.i.h.bf16 %v3584_v10  ;;  %v3585_v20 = vunpack.i.l.bf16 %v3584_v10  ;;  %v3589_v27 = vpop.permute.xlu1 %3588 }
 0x140   : > { %v3591_v40 = vunpack.i.h.bf16 %v3589_v27  ;;  %v3590_v55 = vunpack.i.l.bf16 %v3589_v27  ;;  %1985 = vmatmul.mubr.bf16.gmra.mrb[48].mxu0 %v1721_v62 }
 0x141   : > { %v1526_v56 = vsel %vm1499_vm1, %v1493_v31, %v3585_v20  ;;  %v1527_v47 = vsel %vm1499_vm1, %v1494_v54, %v3586_v12  ;;  %2957 = vmatprep.mubr.msk.bf16.mxu0 %vm1466_vm0, %v1724_v34  ;;  %v2932_v12 = vld [vmem:[%s3803_s10 + $0x19a] sm:$0xff]  ;;  %v2933_v20 = vld [vmem:[%s3803_s10 + $0x1a2] sm:$0xff] }
 0x142   : > { %v3594_v9 = vpop.permute.xlu0 %3593  ;;  %v1559_v44 = vsel %vm1532_vm2, %v1526_v56, %v3590_v55  ;;  %v1560_v45 = vsel %vm1532_vm2, %v1527_v47, %v3591_v40 }
 0x143   : > { %v3596_v13 = vunpack.i.h.bf16 %v3594_v9  ;;  %v3595_v19 = vunpack.i.l.bf16 %v3594_v9  ;;  %v3599_v16 = vpop.permute.xlu1 %3598 }
 0x144   : > { %v3601_v46 = vunpack.i.h.bf16 %v3599_v16  ;;  %v3600_v17 = vunpack.i.l.bf16 %v3599_v16 }
 0x145   : > { %v1592_v6 = vsel %vm1565_vm3, %v1559_v44, %v3595_v19  ;;  %v1593_v41 = vsel %vm1565_vm3, %v1560_v45, %v3596_v13  ;;  %v1728_v19 = vpack.c.bf16 %v2933_v20, %v2932_v12 }
 0x146   : > { %v3604_v42 = vpop.permute.xlu0 %3603  ;;  %v1625_v23 = vsel %vm1598_vm4, %v1592_v6, %v3600_v17  ;;  %v1626_v32 = vsel %vm1598_vm4, %v1593_v41, %v3601_v46 }
 0x147   : > { %v3606_v22 = vunpack.i.h.bf16 %v3604_v42  ;;  %v3605_v24 = vunpack.i.l.bf16 %v3604_v42  ;;  %v3609_v26 = vpop.permute.xlu1 %3608 }
 0x148   : > { %v3611_v33 = vunpack.i.h.bf16 %v3609_v26  ;;  %v3610_v30 = vunpack.i.l.bf16 %v3609_v26 }
 0x149   : > { %v1658_v28 = vsel %vm1631_vm5, %v1625_v23, %v3605_v24  ;;  %v1659_v35 = vsel %vm1631_vm5, %v1626_v32, %v3606_v22 }
 0x14a   : > { %v3614_v11 = vpop.permute.xlu0 %3613  ;;  %v1691_v36 = vsel %vm1664_vm6, %v1658_v28, %v3610_v30  ;;  %v1692_v37 = vsel %vm1664_vm6, %v1659_v35, %v3611_v33 }
 0x14b   : > { %v3616_v18 = vunpack.i.h.bf16 %v3614_v11  ;;  %v3615_v39 = vunpack.i.l.bf16 %v3614_v11  ;;  %v3619_v49 = vpop.permute.xlu1 %3618  ;;  %v1723_v50 = vpack.c.bf16 %v1692_v37, %v1691_v36 }
 0x14c   : > { %v3621_v51 = vunpack.i.h.bf16 %v3619_v49  ;;  %v3620_v52 = vunpack.i.l.bf16 %v3619_v49 }
 0x14d   : > { %v1495_v48 = vsel %vm1466_vm0, %v4169_v25, %v3615_v39  ;;  %v1496_v38 = vsel %vm1466_vm0, %v4172_v14, %v3616_v18  ;;  %1993 = vmatmul.mubr.bf16.gmra.mrb[52].mxu0 %v1723_v50 }
 0x14e   : > { %v3624_v53 = vpop.permute.xlu0 %3623  ;;  %2958 = vmatprep.mubr.msk.bf16.mxu0 %vm1466_vm0, %v1726_v29  ;;  %v1528_v60 = vsel %vm1499_vm1, %v1495_v48, %v3620_v52  ;;  %v1529_v63 = vsel %vm1499_vm1, %v1496_v38, %v3621_v51 }
 0x14f   : > { %v3626_v7 = vunpack.i.h.bf16 %v3624_v53  ;;  %v3625_v57 = vunpack.i.l.bf16 %v3624_v53  ;;  %v3629_v58 = vpop.permute.xlu1 %3628 }
 0x150   : > { %v3631_v0 = vunpack.i.h.bf16 %v3629_v58  ;;  %v3630_v8 = vunpack.i.l.bf16 %v3629_v58  ;;  %v4495_v58 = vld [vmem:[%s4660_s2] ss:$0 sm:$0xff] }
 0x151   : > { %v1561_v25 = vsel %vm1532_vm2, %v1528_v60, %v3625_v57  ;;  %v1562_v21 = vsel %vm1532_vm2, %v1529_v63, %v3626_v7 }
 0x152   : > { %v3634_v14 = vpop.permute.xlu0 %3633  ;;  %v1594_v59 = vsel %vm1565_vm3, %v1561_v25, %v3630_v8  ;;  %v1595_v61 = vsel %vm1565_vm3, %v1562_v21, %v3631_v0 }
 0x153   : > { %v3636_v1 = vunpack.i.h.bf16 %v3634_v14  ;;  %v3635_v2 = vunpack.i.l.bf16 %v3634_v14  ;;  %v3639_v43 = vpop.permute.xlu1 %3638 }
 0x154   : > { %v3641_v3 = vunpack.i.h.bf16 %v3639_v43  ;;  %v3640_v5 = vunpack.i.l.bf16 %v3639_v43 }
 0x155   : > { %v1627_v34 = vsel %vm1598_vm4, %v1594_v59, %v3635_v2  ;;  %v1628_v10 = vsel %vm1598_vm4, %v1595_v61, %v3636_v1 }
 0x156   : > { %v3644_v62 = vpop.permute.xlu0 %3643  ;;  %v1660_v40 = vsel %vm1631_vm5, %v1627_v34, %v3640_v5  ;;  %v1661_v55 = vsel %vm1631_vm5, %v1628_v10, %v3641_v3 }
 0x157   : > { %v3646_v27 = vunpack.i.h.bf16 %v3644_v62  ;;  %v3645_v31 = vunpack.i.l.bf16 %v3644_v62  ;;  %v3649_v54 = vpop.permute.xlu1 %3648 }
 0x158   : > { %v3651_v56 = vunpack.i.h.bf16 %v3649_v54  ;;  %v3650_v47 = vunpack.i.l.bf16 %v3649_v54 }
 0x159   : > { %v1693_v9 = vsel %vm1664_vm6, %v1660_v40, %v3645_v31  ;;  %v1694_v13 = vsel %vm1664_vm6, %v1661_v55, %v3646_v27 }
 0x15a   : > { %v3654_v16 = vpop.permute.xlu0 %3653  ;;  %v1725_v44 = vpack.c.bf16 %v1694_v13, %v1693_v9  ;;  %v1497_v6 = vsel %vm1466_vm0, %v4219_v4, %v3650_v47  ;;  %v1498_v41 = vsel %vm1466_vm0, %v4222_v15, %v3651_v56 }
 0x15b   : > { %v3656_v45 = vunpack.i.h.bf16 %v3654_v16  ;;  %v3655_v46 = vunpack.i.l.bf16 %v3654_v16  ;;  %v3659_v17 = vpop.permute.xlu1 %3658 }
 0x15c   : > { %v3661_v42 = vunpack.i.h.bf16 %v3659_v17  ;;  %v3660_v22 = vunpack.i.l.bf16 %v3659_v17  ;;  %2001 = vmatmul.mubr.bf16.gmra.mrb[56].mxu0 %v1725_v44 }
 0x15d   : > { %v1530_v24 = vsel %vm1499_vm1, %v1497_v6, %v3655_v46  ;;  %v1531_v26 = vsel %vm1499_vm1, %v1498_v41, %v3656_v45  ;;  %2959 = vmatprep.mubr.msk.bf16.mxu0 %vm1466_vm0, %v1728_v19 }
 0x15e   : > { %v3664_v23 = vpop.permute.xlu0 %3663  ;;  %v1563_v28 = vsel %vm1532_vm2, %v1530_v24, %v3660_v22  ;;  %v1564_v4 = vsel %vm1532_vm2, %v1531_v26, %v3661_v42 }
 0x15f   : > { %v3666_v32 = vunpack.i.h.bf16 %v3664_v23  ;;  %v3665_v33 = vunpack.i.l.bf16 %v3664_v23  ;;  %v3669_v30 = vpop.permute.xlu1 %3668 }
 0x160   : > { %v3671_v35 = vunpack.i.h.bf16 %v3669_v30  ;;  %v3670_v11 = vunpack.i.l.bf16 %v3669_v30 }
 0x161   : > { %v1596_v15 = vsel %vm1565_vm3, %v1563_v28, %v3665_v33  ;;  %v1597_v36 = vsel %vm1565_vm3, %v1564_v4, %v3666_v32 }
 0x162   : > { %v3674_v37 = vpop.permute.xlu0 %3673  ;;  %v1629_v49 = vsel %vm1598_vm4, %v1596_v15, %v3670_v11  ;;  %v1630_v50 = vsel %vm1598_vm4, %v1597_v36, %v3671_v35 }
 0x163   : > { %v3676_v29 = vunpack.i.h.bf16 %v3674_v37  ;;  %v3675_v18 = vunpack.i.l.bf16 %v3674_v37  ;;  %v3679_v39 = vpop.permute.xlu1 %3678 }
 0x164   : > { %v3681_v51 = vunpack.i.h.bf16 %v3679_v39  ;;  %v3680_v52 = vunpack.i.l.bf16 %v3679_v39 }
 0x165   : > { %v1662_v48 = vsel %vm1631_vm5, %v1629_v49, %v3675_v18  ;;  %v1663_v38 = vsel %vm1631_vm5, %v1630_v50, %v3676_v29 }
 0x166   : > { %v1695_v53 = vsel %vm1664_vm6, %v1662_v48, %v3680_v52  ;;  %v1696_v7 = vsel %vm1664_vm6, %v1663_v38, %v3681_v51 }
 0x167   : > { %v1727_v57 = vpack.c.bf16 %v1696_v7, %v1695_v53 }
 0x169   : > { %2009 = vmatmul.mubr.bf16.gmra.mrb[60].mxu0 %v1727_v57 }
 0x16b   : > { %v1890_v60 = vpop.f32.mrb[0].mxu0 }
 0x16c   : > { %v1891_v63 = vadd.f32 %v4495_v58, %v1890_v60  ;;  %v1892_v0 = vpop.f32.mrb[1].mxu0 }
 0x16d   : > { %v1893_v8 = vpop.f32.mrb[2].mxu0 }
 0x16e   : > { %v1894_v25 = vadd.f32 %v4495_v58, %v1893_v8  ;;  %v1895_v21 = vpop.f32.mrb[3].mxu0  ;;  %v2017_v14 = vmax.f32 %v1891_v63, 0.0 }
 0x170   : > { %v2018_v1 = vmax.f32 %v1894_v25, 0.0 }
 0x172   : > { %v2049_v2 = vpack.c.bf16 %v2018_v1, %v2017_v14 }
 0x174   : > { %3036 = vmatprep.mubr.msk.bf16.mxu1 %vm2073_vm8, %v2049_v2 }
 0x178   : > { %v1898_v43 = vpop.f32.mrb[4].mxu0 }
 0x179   : > { %v1899_v59 = vadd.f32 %v4495_v58, %v1898_v43  ;;  %v1900_v61 = vpop.f32.mrb[5].mxu0  ;;  %v3691_v43 = vld [vmem:[%s4663_s5] sm:$0xff]  }
 0x17a   : > { %v1901_v3 = vpop.f32.mrb[6].mxu0  ;;  %3068 = vmatprep.subr.bf16.mxu1 %v3691_v43 }
 0x17b   : > { %v1902_v5 = vadd.f32 %v4495_v58, %v1901_v3  ;;  %v1903_v34 = vpop.f32.mrb[7].mxu0  ;;  %v2019_v10 = vmax.f32 %v1899_v59, 0.0  ;;  %v3692_v59 = vld [vmem:[%s4663_s5 + $0x8] sm:$0xff]  }
 0x17d   : > { %v2020_v62 = vmax.f32 %v1902_v5, 0.0 }
 0x17f   : > { %v2050_v12 = vpack.c.bf16 %v2020_v62, %v2019_v10 }
 0x181   : > { %3037 = vmatmul.mubr.msk.bf16.vlgmr.msra.gmra.mrb[0].mxu1 %vm2073_vm8, %v2050_v12 }
 0x182   : > { %3069 = vmatpush3.bf16.msra.mxu1 %v3691_v43 }
 0x183   : > { %3070 = vmatprep.subr.bf16.mxu1 %v3692_v59 }
 0x186   : > { %3071 = vmatpush3.bf16.msra.mxu1 %v3692_v59 }
 0x187   : > { %v1906_v20 = vpop.f32.mrb[8].mxu0 }
 0x188   : > { %v1907_v27 = vadd.f32 %v4495_v58, %v1906_v20  ;;  %v1908_v31 = vpop.f32.mrb[9].mxu0 }
 0x189   : > { %v1909_v54 = vpop.f32.mrb[10].mxu0 }
 0x18a   : > { %v1910_v40 = vadd.f32 %v4495_v58, %v1909_v54  ;;  %v1911_v55 = vpop.f32.mrb[11].mxu0  ;;  %v2021_v56 = vmax.f32 %v1907_v27, 0.0 }
 0x18c   : > { %v2022_v47 = vmax.f32 %v1910_v40, 0.0 }
 0x18e   : > { %v2051_v9 = vpack.c.bf16 %v2022_v47, %v2021_v56 }
 0x190   : > { %3040 = vmatprep.mubr.msk.bf16.mxu1 %vm2073_vm8, %v2051_v9 }
 0x194   : > { %v1914_v13 = vpop.f32.mrb[12].mxu0 }
 0x195   : > { %v1915_v19 = vadd.f32 %v4495_v58, %v1914_v13  ;;  %v1916_v16 = vpop.f32.mrb[13].mxu0 }
 0x196   : > { %v1917_v44 = vpop.f32.mrb[14].mxu0 }
 0x197   : > { %v1918_v45 = vadd.f32 %v4495_v58, %v1917_v44  ;;  %v1919_v46 = vpop.f32.mrb[15].mxu0  ;;  %v2023_v17 = vmax.f32 %v1915_v19, 0.0 }
 0x199   : > { %v2024_v6 = vmax.f32 %v1918_v45, 0.0 }
 0x19b   : > { %v2052_v41 = vpack.c.bf16 %v2024_v6, %v2023_v17 }
 0x19d   : > { %3041 = vmatmul.mubr.msk.bf16.gmra.mrb[4].mxu1 %vm2073_vm8, %v2052_v41 }
 0x1a3   : > { %v1922_v42 = vpop.f32.mrb[16].mxu0 }
 0x1a4   : > { %v1923_v22 = vadd.f32 %v4495_v58, %v1922_v42  ;;  %v1924_v24 = vpop.f32.mrb[17].mxu0 }
 0x1a5   : > { %v1925_v26 = vpop.f32.mrb[18].mxu0 }
 0x1a6   : > { %v1926_v23 = vadd.f32 %v4495_v58, %v1925_v26  ;;  %v1927_v32 = vpop.f32.mrb[19].mxu0  ;;  %v2025_v33 = vmax.f32 %v1923_v22, 0.0 }
 0x1a8   : > { %v2026_v30 = vmax.f32 %v1926_v23, 0.0 }
 0x1aa   : > { %v2053_v28 = vpack.c.bf16 %v2026_v30, %v2025_v33 }
 0x1ac   : > { %3044 = vmatprep.mubr.msk.bf16.mxu1 %vm2073_vm8, %v2053_v28 }
 0x1b0   : > { %v1930_v4 = vpop.f32.mrb[20].mxu0 }
 0x1b1   : > { %v1931_v35 = vadd.f32 %v4495_v58, %v1930_v4  ;;  %v1932_v11 = vpop.f32.mrb[21].mxu0 }
 0x1b2   : > { %v1933_v15 = vpop.f32.mrb[22].mxu0 }
 0x1b3   : > { %v1934_v36 = vadd.f32 %v4495_v58, %v1933_v15  ;;  %v1935_v37 = vpop.f32.mrb[23].mxu0  ;;  %v2027_v29 = vmax.f32 %v1931_v35, 0.0 }
 0x1b5   : > { %v2028_v18 = vmax.f32 %v1934_v36, 0.0 }
 0x1b7   : > { %v2054_v39 = vpack.c.bf16 %v2028_v18, %v2027_v29 }
 0x1b9   : > { %3045 = vmatmul.mubr.msk.bf16.gmra.mrb[8].mxu1 %vm2073_vm8, %v2054_v39 }
 0x1bf   : > { %v1938_v49 = vpop.f32.mrb[24].mxu0 }
 0x1c0   : > { %v1939_v50 = vadd.f32 %v4495_v58, %v1938_v49  ;;  %v1940_v51 = vpop.f32.mrb[25].mxu0 }
 0x1c1   : > { %v1941_v52 = vpop.f32.mrb[26].mxu0 }
 0x1c2   : > { %v1942_v48 = vadd.f32 %v4495_v58, %v1941_v52  ;;  %v1943_v38 = vpop.f32.mrb[27].mxu0  ;;  %v2029_v53 = vmax.f32 %v1939_v50, 0.0 }
 0x1c4   : > { %v2030_v7 = vmax.f32 %v1942_v48, 0.0 }
 0x1c6   : > { %v2055_v57 = vpack.c.bf16 %v2030_v7, %v2029_v53 }
 0x1c8   : > { %3048 = vmatprep.mubr.msk.bf16.mxu1 %vm2073_vm8, %v2055_v57 }
 0x1cc   : > { %v1946_v60 = vpop.f32.mrb[28].mxu0 }
 0x1cd   : > { %v1947_v63 = vadd.f32 %v4495_v58, %v1946_v60  ;;  %v1948_v0 = vpop.f32.mrb[29].mxu0 }
 0x1ce   : > { %v1949_v8 = vpop.f32.mrb[30].mxu0 }
 0x1cf   : > { %v1950_v25 = vadd.f32 %v4495_v58, %v1949_v8  ;;  %v1951_v21 = vpop.f32.mrb[31].mxu0  ;;  %v2031_v14 = vmax.f32 %v1947_v63, 0.0 }
 0x1d1   : > { %v2032_v1 = vmax.f32 %v1950_v25, 0.0 }
 0x1d3   : > { %v2056_v2 = vpack.c.bf16 %v2032_v1, %v2031_v14 }
 0x1d5   : > { %3049 = vmatmul.mubr.msk.bf16.gmra.mrb[12].mxu1 %vm2073_vm8, %v2056_v2 }
 0x1db   : > { %v1954_v61 = vpop.f32.mrb[32].mxu0 }
 0x1dc   : > { %v1955_v3 = vadd.f32 %v4495_v58, %v1954_v61  ;;  %v1956_v5 = vpop.f32.mrb[33].mxu0 }
 0x1dd   : > { %v1957_v34 = vpop.f32.mrb[34].mxu0 }
 0x1de   : > { %v1958_v10 = vadd.f32 %v4495_v58, %v1957_v34  ;;  %v1959_v62 = vpop.f32.mrb[35].mxu0  ;;  %v2033_v12 = vmax.f32 %v1955_v3, 0.0 }
 0x1e0   : > { %v2034_v20 = vmax.f32 %v1958_v10, 0.0 }
 0x1e2   : > { %v2057_v27 = vpack.c.bf16 %v2034_v20, %v2033_v12 }
 0x1e4   : > { %3052 = vmatprep.mubr.msk.bf16.mxu1 %vm2073_vm8, %v2057_v27 }
 0x1e8   : > { %v1962_v31 = vpop.f32.mrb[36].mxu0 }
 0x1e9   : > { %v1963_v54 = vadd.f32 %v4495_v58, %v1962_v31  ;;  %v1964_v40 = vpop.f32.mrb[37].mxu0  ;;  %v4554_v31 = vld [vmem:[%s4662_s4] ss:$0 sm:$0xff] }
 0x1ea   : > { %v1965_v55 = vpop.f32.mrb[38].mxu0 }
 0x1eb   : > { %v1966_v56 = vadd.f32 %v4495_v58, %v1965_v55  ;;  %v1967_v47 = vpop.f32.mrb[39].mxu0  ;;  %v2035_v9 = vmax.f32 %v1963_v54, 0.0 }
 0x1ed   : > { %v2036_v13 = vmax.f32 %v1966_v56, 0.0 }
 0x1ef   : > { %v2058_v19 = vpack.c.bf16 %v2036_v13, %v2035_v9 }
 0x1f1   : > { %3053 = vmatmul.mubr.msk.bf16.gmra.mrb[16].mxu1 %vm2073_vm8, %v2058_v19 }
 0x1f7   : > { %v1970_v16 = vpop.f32.mrb[40].mxu0 }
 0x1f8   : > { %v1971_v44 = vadd.f32 %v4495_v58, %v1970_v16  ;;  %v1972_v45 = vpop.f32.mrb[41].mxu0 }
 0x1f9   : > { %v1973_v46 = vpop.f32.mrb[42].mxu0 }
 0x1fa   : > { %v1974_v17 = vadd.f32 %v4495_v58, %v1973_v46  ;;  %v1975_v6 = vpop.f32.mrb[43].mxu0  ;;  %v2037_v41 = vmax.f32 %v1971_v44, 0.0 }
 0x1fc   : > { %v2038_v42 = vmax.f32 %v1974_v17, 0.0 }
 0x1fe   : > { %v2059_v22 = vpack.c.bf16 %v2038_v42, %v2037_v41 }
 0x200   : > { %3056 = vmatprep.mubr.msk.bf16.mxu1 %vm2073_vm8, %v2059_v22 }
 0x204   : > { %v1978_v24 = vpop.f32.mrb[44].mxu0 }
 0x205   : > { %v1979_v26 = vadd.f32 %v4495_v58, %v1978_v24  ;;  %v1980_v23 = vpop.f32.mrb[45].mxu0 }
 0x206   : > { %v1981_v32 = vpop.f32.mrb[46].mxu0 }
 0x207   : > { %v1982_v33 = vadd.f32 %v4495_v58, %v1981_v32  ;;  %v1983_v30 = vpop.f32.mrb[47].mxu0  ;;  %v2039_v28 = vmax.f32 %v1979_v26, 0.0 }
 0x209   : > { %v2040_v4 = vmax.f32 %v1982_v33, 0.0 }
 0x20b   : > { %v2060_v35 = vpack.c.bf16 %v2040_v4, %v2039_v28 }
 0x20d   : > { %3057 = vmatmul.mubr.msk.bf16.gmra.mrb[20].mxu1 %vm2073_vm8, %v2060_v35 }
 0x213   : > { %v1986_v11 = vpop.f32.mrb[48].mxu0 }
 0x214   : > { %v1987_v15 = vadd.f32 %v4495_v58, %v1986_v11  ;;  %v1988_v36 = vpop.f32.mrb[49].mxu0 }
 0x215   : > { %v1989_v37 = vpop.f32.mrb[50].mxu0 }
 0x216   : > { %v1990_v29 = vadd.f32 %v4495_v58, %v1989_v37  ;;  %v1991_v18 = vpop.f32.mrb[51].mxu0  ;;  %v2041_v39 = vmax.f32 %v1987_v15, 0.0 }
 0x218   : > { %v2042_v49 = vmax.f32 %v1990_v29, 0.0 }
 0x21a   : > { %v2061_v50 = vpack.c.bf16 %v2042_v49, %v2041_v39 }
 0x21c   : > { %3060 = vmatprep.mubr.msk.bf16.mxu1 %vm2073_vm8, %v2061_v50 }
 0x220   : > { %v1994_v51 = vpop.f32.mrb[52].mxu0 }
 0x221   : > { %v1995_v52 = vadd.f32 %v4495_v58, %v1994_v51  ;;  %v1996_v48 = vpop.f32.mrb[53].mxu0 }
 0x222   : > { %v1997_v38 = vpop.f32.mrb[54].mxu0 }
 0x223   : > { %v1998_v53 = vadd.f32 %v4495_v58, %v1997_v38  ;;  %v1999_v7 = vpop.f32.mrb[55].mxu0  ;;  %v2043_v57 = vmax.f32 %v1995_v52, 0.0 }
 0x225   : > { %v2044_v60 = vmax.f32 %v1998_v53, 0.0 }
 0x227   : > { %v2062_v63 = vpack.c.bf16 %v2044_v60, %v2043_v57 }
 0x229   : > { %3061 = vmatmul.mubr.msk.bf16.gmra.mrb[24].mxu1 %vm2073_vm8, %v2062_v63 }
 0x22f   : > { %v2002_v0 = vpop.f32.mrb[56].mxu0 }
 0x230   : > { %v2003_v8 = vadd.f32 %v4495_v58, %v2002_v0  ;;  %v2004_v25 = vpop.f32.mrb[57].mxu0 }
 0x231   : > { %v2005_v21 = vpop.f32.mrb[58].mxu0 }
 0x232   : > { %v2006_v14 = vadd.f32 %v4495_v58, %v2005_v21  ;;  %v2007_v1 = vpop.f32.mrb[59].mxu0  ;;  %v2045_v2 = vmax.f32 %v2003_v8, 0.0 }
 0x234   : > { %v2046_v43 = vmax.f32 %v2006_v14, 0.0 }
 0x236   : > { %v2063_v59 = vpack.c.bf16 %v2046_v43, %v2045_v2 }
 0x238   : > { %3064 = vmatprep.mubr.msk.bf16.mxu1 %vm2073_vm8, %v2063_v59 }
 0x23c   : > { %v2010_v61 = vpop.f32.mrb[60].mxu0 }
 0x23d   : > { %v2011_v3 = vadd.f32 %v4495_v58, %v2010_v61  ;;  %v2012_v5 = vpop.f32.mrb[61].mxu0 }
 0x23e   : > { %v2013_v34 = vpop.f32.mrb[62].mxu0 }
 0x23f   : > { %v2014_v10 = vadd.f32 %v4495_v58, %v2013_v34  ;;  %v2015_v62 = vpop.f32.mrb[63].mxu0  ;;  %v2047_v12 = vmax.f32 %v2011_v3, 0.0 }
 0x241   : > { %v2048_v20 = vmax.f32 %v2014_v10, 0.0 }
 0x243   : > { %v2064_v27 = vpack.c.bf16 %v2048_v20, %v2047_v12 }
 0x245   : > { %3065 = vmatmul.mubr.msk.bf16.gmra.mrb[28].mxu1 %vm2073_vm8, %v2064_v27 }
 0x254   : > { %v3038_v54 = vpop.f32.mrb[0].mxu1 }
 0x255   : > { %v2169_v40 = vadd.f32 %v3038_v54, %v4554_v31  ;;  %v2160_v55 = vpop.f32.mrb[1].mxu1 }
 0x256   : > { %v2161_v56 = vadd.f32 %v4554_v31, %v2160_v55  ;;  %v3039_v47 = vpop.f32.mrb[2].mxu1 }
 0x257   : > { %v2172_v58 = vadd.f32 %v3039_v47, %v4554_v31  ;;  %v2163_v9 = vpop.f32.mrb[3].mxu1  ;;  %v2289_v19 = vmax.f32 %v2169_v40, 0.0 }
 0x258   : > { %v2164_v13 = vadd.f32 %v4554_v31, %v2163_v9  ;;  %v2287_v44 = vmax.f32 %v2161_v56, 0.0 }
 0x259   : > { %v2290_v16 = vmax.f32 %v2172_v58, 0.0 }
 0x25a   : > { %v2288_v45 = vmax.f32 %v2164_v13, 0.0 }
 0x25b   : > { %v2320_v46 = vpack.c.bf16 %v2290_v16, %v2289_v19 }
 0x25c   : > { %v2319_v17 = vpack.c.bf16 %v2288_v45, %v2287_v44 }
 0x25e   : > { %3072 = vmatprep.mubr.msk.bf16.mxu1 %vm1499_vm1, %v2319_v17 }
 0x25f   : > { %3073 = vmatmul.mubr.msk.bf16.vlgmr.msra.gmra.mrb[32].mxu1 %vm1499_vm1, %v2320_v46 }
 0x270   : > { %v3042_v6 = vpop.f32.mrb[4].mxu1 }
 0x271   : > { %v2185_v41 = vadd.f32 %v3042_v6, %v4554_v31  ;;  %v2176_v42 = vpop.f32.mrb[5].mxu1 }
 0x272   : > { %v2177_v22 = vadd.f32 %v4554_v31, %v2176_v42  ;;  %v3043_v24 = vpop.f32.mrb[6].mxu1 }
 0x273   : > { %v2188_v26 = vadd.f32 %v3043_v24, %v4554_v31  ;;  %v2179_v23 = vpop.f32.mrb[7].mxu1  ;;  %v2293_v33 = vmax.f32 %v2185_v41, 0.0 }
 0x274   : > { %v2180_v32 = vadd.f32 %v4554_v31, %v2179_v23  ;;  %v2291_v28 = vmax.f32 %v2177_v22, 0.0 }
 0x275   : > { %v2294_v30 = vmax.f32 %v2188_v26, 0.0 }
 0x276   : > { %v2292_v4 = vmax.f32 %v2180_v32, 0.0 }
 0x277   : > { %v2322_v35 = vpack.c.bf16 %v2294_v30, %v2293_v33 }
 0x278   : > { %v2321_v11 = vpack.c.bf16 %v2292_v4, %v2291_v28 }
 0x27a   : > { %3076 = vmatprep.mubr.msk.bf16.mxu1 %vm1499_vm1, %v2321_v11 }
 0x27b   : > { %3077 = vmatmul.mubr.msk.bf16.gmra.mrb[36].mxu1 %vm1499_vm1, %v2322_v35 }
 0x28c   : > { %v3046_v15 = vpop.f32.mrb[8].mxu1 }
 0x28d   : > { %v2201_v36 = vadd.f32 %v3046_v15, %v4554_v31  ;;  %v2192_v37 = vpop.f32.mrb[9].mxu1 }
 0x28e   : > { %v2193_v29 = vadd.f32 %v4554_v31, %v2192_v37  ;;  %v3047_v18 = vpop.f32.mrb[10].mxu1 }
 0x28f   : > { %v2204_v39 = vadd.f32 %v3047_v18, %v4554_v31  ;;  %v2195_v49 = vpop.f32.mrb[11].mxu1  ;;  %v2297_v51 = vmax.f32 %v2201_v36, 0.0 }
 0x290   : > { %v2196_v50 = vadd.f32 %v4554_v31, %v2195_v49  ;;  %v2295_v48 = vmax.f32 %v2193_v29, 0.0 }
 0x291   : > { %v2298_v52 = vmax.f32 %v2204_v39, 0.0 }
 0x292   : > { %v2296_v38 = vmax.f32 %v2196_v50, 0.0 }
 0x293   : > { %v2324_v53 = vpack.c.bf16 %v2298_v52, %v2297_v51 }
 0x294   : > { %v2323_v7 = vpack.c.bf16 %v2296_v38, %v2295_v48 }
 0x296   : > { %3080 = vmatprep.mubr.msk.bf16.mxu1 %vm1499_vm1, %v2323_v7 }
 0x297   : > { %3081 = vmatmul.mubr.msk.bf16.gmra.mrb[40].mxu1 %vm1499_vm1, %v2324_v53 }
 0x2a8   : > { %v3050_v57 = vpop.f32.mrb[12].mxu1 }
 0x2a9   : > { %v2217_v60 = vadd.f32 %v3050_v57, %v4554_v31  ;;  %v2208_v63 = vpop.f32.mrb[13].mxu1 }
 0x2aa   : > { %v2209_v0 = vadd.f32 %v4554_v31, %v2208_v63  ;;  %v3051_v8 = vpop.f32.mrb[14].mxu1 }
 0x2ab   : > { %v2220_v25 = vadd.f32 %v3051_v8, %v4554_v31  ;;  %v2211_v21 = vpop.f32.mrb[15].mxu1  ;;  %v2301_v1 = vmax.f32 %v2217_v60, 0.0 }
 0x2ac   : > { %v2212_v14 = vadd.f32 %v4554_v31, %v2211_v21  ;;  %v2299_v43 = vmax.f32 %v2209_v0, 0.0 }
 0x2ad   : > { %v2302_v2 = vmax.f32 %v2220_v25, 0.0 }
 0x2ae   : > { %v2300_v59 = vmax.f32 %v2212_v14, 0.0  ;;  %v4607_v14 = vld [vmem:[%s4664_s6] ss:$0 sm:$0xff] }
 0x2af   : > { %v2326_v61 = vpack.c.bf16 %v2302_v2, %v2301_v1 }
 0x2b0   : > { %v2325_v3 = vpack.c.bf16 %v2300_v59, %v2299_v43 }
 0x2b2   : > { %3084 = vmatprep.mubr.msk.bf16.mxu1 %vm1499_vm1, %v2325_v3 }
 0x2b3   : > { %3085 = vmatmul.mubr.msk.bf16.gmra.mrb[44].mxu1 %vm1499_vm1, %v2326_v61 }
 0x2c4   : > { %v3054_v5 = vpop.f32.mrb[16].mxu1 }
 0x2c5   : > { %v2233_v34 = vadd.f32 %v3054_v5, %v4554_v31  ;;  %v2224_v10 = vpop.f32.mrb[17].mxu1 }
 0x2c6   : > { %v2225_v62 = vadd.f32 %v4554_v31, %v2224_v10  ;;  %v3055_v12 = vpop.f32.mrb[18].mxu1 }
 0x2c7   : > { %v2236_v20 = vadd.f32 %v3055_v12, %v4554_v31  ;;  %v2227_v27 = vpop.f32.mrb[19].mxu1  ;;  %v2305_v40 = vmax.f32 %v2233_v34, 0.0 }
 0x2c8   : > { %v2228_v54 = vadd.f32 %v4554_v31, %v2227_v27  ;;  %v2303_v56 = vmax.f32 %v2225_v62, 0.0 }
 0x2c9   : > { %v2306_v55 = vmax.f32 %v2236_v20, 0.0 }
 0x2ca   : > { %v2304_v47 = vmax.f32 %v2228_v54, 0.0 }
 0x2cb   : > { %v2328_v58 = vpack.c.bf16 %v2306_v55, %v2305_v40 }
 0x2cc   : > { %v2327_v9 = vpack.c.bf16 %v2304_v47, %v2303_v56 }
 0x2ce   : > { %3088 = vmatprep.mubr.msk.bf16.mxu1 %vm1499_vm1, %v2327_v9 }
 0x2cf   : > { %3089 = vmatmul.mubr.msk.bf16.gmra.mrb[48].mxu1 %vm1499_vm1, %v2328_v58 }
 0x2e0   : > { %v3058_v13 = vpop.f32.mrb[20].mxu1 }
 0x2e1   : > { %v2249_v19 = vadd.f32 %v3058_v13, %v4554_v31  ;;  %v2240_v16 = vpop.f32.mrb[21].mxu1 }
 0x2e2   : > { %v2241_v44 = vadd.f32 %v4554_v31, %v2240_v16  ;;  %v3059_v45 = vpop.f32.mrb[22].mxu1 }
 0x2e3   : > { %v2252_v46 = vadd.f32 %v3059_v45, %v4554_v31  ;;  %v2243_v17 = vpop.f32.mrb[23].mxu1  ;;  %v2309_v41 = vmax.f32 %v2249_v19, 0.0 }
 0x2e4   : > { %v2244_v6 = vadd.f32 %v4554_v31, %v2243_v17  ;;  %v2307_v22 = vmax.f32 %v2241_v44, 0.0 }
 0x2e5   : > { %v2310_v42 = vmax.f32 %v2252_v46, 0.0 }
 0x2e6   : > { %v2308_v24 = vmax.f32 %v2244_v6, 0.0 }
 0x2e7   : > { %v2330_v26 = vpack.c.bf16 %v2310_v42, %v2309_v41 }
 0x2e8   : > { %v2329_v23 = vpack.c.bf16 %v2308_v24, %v2307_v22 }
 0x2ea   : > { %3092 = vmatprep.mubr.msk.bf16.mxu1 %vm1499_vm1, %v2329_v23 }
 0x2eb   : > { %3093 = vmatmul.mubr.msk.bf16.gmra.mrb[52].mxu1 %vm1499_vm1, %v2330_v26 }
 0x2fc   : > { %v3062_v32 = vpop.f32.mrb[24].mxu1 }
 0x2fd   : > { %v2265_v33 = vadd.f32 %v3062_v32, %v4554_v31  ;;  %v2256_v30 = vpop.f32.mrb[25].mxu1 }
 0x2fe   : > { %v2257_v28 = vadd.f32 %v4554_v31, %v2256_v30  ;;  %v3063_v4 = vpop.f32.mrb[26].mxu1 }
 0x2ff   : > { %v2268_v35 = vadd.f32 %v3063_v4, %v4554_v31  ;;  %v2259_v11 = vpop.f32.mrb[27].mxu1  ;;  %v2313_v36 = vmax.f32 %v2265_v33, 0.0 }
 0x300   : > { %v2260_v15 = vadd.f32 %v4554_v31, %v2259_v11  ;;  %v2311_v29 = vmax.f32 %v2257_v28, 0.0 }
 0x301   : > { %v2314_v37 = vmax.f32 %v2268_v35, 0.0 }
 0x302   : > { %v2312_v18 = vmax.f32 %v2260_v15, 0.0 }
 0x303   : > { %v2332_v39 = vpack.c.bf16 %v2314_v37, %v2313_v36 }
 0x304   : > { %v2331_v49 = vpack.c.bf16 %v2312_v18, %v2311_v29 }
 0x306   : > { %3096 = vmatprep.mubr.msk.bf16.mxu1 %vm1499_vm1, %v2331_v49 }
 0x307   : > { %3097 = vmatmul.mubr.msk.bf16.gmra.mrb[56].mxu1 %vm1499_vm1, %v2332_v39 }
 0x318   : > { %v3066_v50 = vpop.f32.mrb[28].mxu1 }
 0x319   : > { %v2281_v51 = vadd.f32 %v3066_v50, %v4554_v31  ;;  %v2272_v52 = vpop.f32.mrb[29].mxu1 }
 0x31a   : > { %v2273_v48 = vadd.f32 %v4554_v31, %v2272_v52  ;;  %v3067_v38 = vpop.f32.mrb[30].mxu1 }
 0x31b   : > { %v2284_v53 = vadd.f32 %v3067_v38, %v4554_v31  ;;  %v2275_v7 = vpop.f32.mrb[31].mxu1  ;;  %v2317_v60 = vmax.f32 %v2281_v51, 0.0 }
 0x31c   : > { %v2276_v57 = vadd.f32 %v4554_v31, %v2275_v7  ;;  %v2315_v0 = vmax.f32 %v2273_v48, 0.0 }
 0x31d   : > { %v2318_v63 = vmax.f32 %v2284_v53, 0.0 }
 0x31e   : > { %v2316_v8 = vmax.f32 %v2276_v57, 0.0 }
 0x31f   : > { %v2334_v25 = vpack.c.bf16 %v2318_v63, %v2317_v60 }
 0x320   : > { %v2333_v21 = vpack.c.bf16 %v2316_v8, %v2315_v0 }
 0x322   : > { %3100 = vmatprep.mubr.msk.bf16.mxu1 %vm1499_vm1, %v2333_v21 }
 0x323   : > { %3101 = vmatmul.mubr.msk.bf16.gmra.mrb[60].mxu1 %vm1499_vm1, %v2334_v25 }
 0x332   : > { %v3074_v1 = vpop.f32.mrb[32].mxu1 }
 0x333   : > { %v2440_v2 = vpop.f32.mrb[33].mxu1  ;;  %v2449_v3 = vadd.f32 %v3074_v1, %v4607_v14 }
 0x334   : > { %v2441_v43 = vadd.f32 %v4607_v14, %v2440_v2  ;;  %v3075_v31 = vpop.f32.mrb[34].mxu1 }
 0x335   : > { %v2443_v59 = vpop.f32.mrb[35].mxu1  ;;  %v2452_v5 = vadd.f32 %v3075_v31, %v4607_v14 }
 0x336   : > { %2567 = vxpose.xlu0.b32.start [1/16] (narrow) %v2441_v43, 32  ;;  %v2444_v61 = vadd.f32 %v4607_v14, %v2443_v59 }
 0x33a   : > { %2568 = vxpose.xlu0.b32.cont [2/16] (narrow) %v2444_v61, 32 }
 0x33e   : > { %2569 = vxpose.xlu0.b32.cont [3/16] (narrow) %v2449_v3, 32 }
 0x342   : > { %2570 = vxpose.xlu0.b32.cont [4/16] (narrow) %v2452_v5, 32 }
 0x34e   : > { %v3078_v34 = vpop.f32.mrb[36].mxu1 }
 0x34f   : > { %v2456_v10 = vpop.f32.mrb[37].mxu1  ;;  %v2465_v54 = vadd.f32 %v3078_v34, %v4607_v14 }
 0x350   : > { %v2457_v62 = vadd.f32 %v4607_v14, %v2456_v10  ;;  %v3079_v12 = vpop.f32.mrb[38].mxu1 }
 0x351   : > { %v2459_v20 = vpop.f32.mrb[39].mxu1  ;;  %v2468_v40 = vadd.f32 %v3079_v12, %v4607_v14 }
 0x352   : > { %2571 = vxpose.xlu0.b32.cont [5/16] (narrow) %v2457_v62, 32  ;;  %v2460_v27 = vadd.f32 %v4607_v14, %v2459_v20 }
 0x356   : > { %2572 = vxpose.xlu0.b32.cont [6/16] (narrow) %v2460_v27, 32 }
 0x35a   : > { %2573 = vxpose.xlu0.b32.cont [7/16] (narrow) %v2465_v54, 32 }
 0x35e   : > { %2574 = vxpose.xlu0.b32.cont [8/16] (narrow) %v2468_v40, 32 }
 0x36a   : > { %v3082_v55 = vpop.f32.mrb[40].mxu1 }
 0x36b   : > { %v2472_v56 = vpop.f32.mrb[41].mxu1  ;;  %v2481_v19 = vadd.f32 %v3082_v55, %v4607_v14 }
 0x36c   : > { %v2473_v47 = vadd.f32 %v4607_v14, %v2472_v56  ;;  %v3083_v58 = vpop.f32.mrb[42].mxu1 }
 0x36d   : > { %v2475_v9 = vpop.f32.mrb[43].mxu1  ;;  %v2484_v16 = vadd.f32 %v3083_v58, %v4607_v14 }
 0x36e   : > { %2575 = vxpose.xlu0.b32.cont [9/16] (narrow) %v2473_v47, 32  ;;  %v2476_v13 = vadd.f32 %v4607_v14, %v2475_v9 }
 0x372   : > { %2576 = vxpose.xlu0.b32.cont [10/16] (narrow) %v2476_v13, 32 }
 0x376   : > { %2577 = vxpose.xlu0.b32.cont [11/16] (narrow) %v2481_v19, 32 }
 0x37a   : > { %2578 = vxpose.xlu0.b32.cont [12/16] (narrow) %v2484_v16, 32 }
 0x386   : > { %v3086_v44 = vpop.f32.mrb[44].mxu1 }
 0x387   : > { %v2488_v45 = vpop.f32.mrb[45].mxu1  ;;  %v2497_v42 = vadd.f32 %v3086_v44, %v4607_v14 }
 0x388   : > { %v2489_v46 = vadd.f32 %v4607_v14, %v2488_v45  ;;  %v3087_v17 = vpop.f32.mrb[46].mxu1 }
 0x389   : > { %v2491_v6 = vpop.f32.mrb[47].mxu1  ;;  %v2500_v22 = vadd.f32 %v3087_v17, %v4607_v14 }
 0x38a   : > { %2579 = vxpose.xlu0.b32.cont [13/16] (narrow) %v2489_v46, 32  ;;  %v2492_v41 = vadd.f32 %v4607_v14, %v2491_v6 }
 0x38e   : > { %2580 = vxpose.xlu0.b32.cont [14/16] (narrow) %v2492_v41, 32 }
 0x392   : > { %2581 = vxpose.xlu0.b32.cont [15/16] (narrow) %v2497_v42, 32 }
 0x396   : > { %2582 = vxpose.xlu0.b32.end [16/16] (narrow) %v2500_v22, 32 }
 0x3a2   : > { %v3090_v24 = vpop.f32.mrb[48].mxu1 }
 0x3a3   : > { %v2504_v26 = vpop.f32.mrb[49].mxu1  ;;  %v2513_v28 = vadd.f32 %v3090_v24, %v4607_v14 }
 0x3a4   : > { %v2505_v23 = vadd.f32 %v4607_v14, %v2504_v26  ;;  %v3091_v32 = vpop.f32.mrb[50].mxu1 }
 0x3a5   : > { %v2507_v33 = vpop.f32.mrb[51].mxu1  ;;  %v2516_v4 = vadd.f32 %v3091_v32, %v4607_v14 }
 0x3a6   : > { %2599 = vxpose.xlu1.b32.start [1/16] (narrow) %v2505_v23, 32  ;;  %v2508_v30 = vadd.f32 %v4607_v14, %v2507_v33 }
 0x3aa   : > { %2600 = vxpose.xlu1.b32.cont [2/16] (narrow) %v2508_v30, 32 }
 0x3ae   : > { %2601 = vxpose.xlu1.b32.cont [3/16] (narrow) %v2513_v28, 32 }
 0x3b2   : > { %2602 = vxpose.xlu1.b32.cont [4/16] (narrow) %v2516_v4, 32 }
 0x3be   : > { %v3094_v35 = vpop.f32.mrb[52].mxu1 }
 0x3bf   : > { %v2520_v11 = vpop.f32.mrb[53].mxu1  ;;  %v2529_v18 = vadd.f32 %v3094_v35, %v4607_v14 }
 0x3c0   : > { %v2521_v15 = vadd.f32 %v4607_v14, %v2520_v11  ;;  %v3095_v36 = vpop.f32.mrb[54].mxu1 }
 0x3c1   : > { %v2523_v37 = vpop.f32.mrb[55].mxu1  ;;  %v2532_v39 = vadd.f32 %v3095_v36, %v4607_v14 }
 0x3c2   : > { %2603 = vxpose.xlu1.b32.cont [5/16] (narrow) %v2521_v15, 32  ;;  %v2524_v29 = vadd.f32 %v4607_v14, %v2523_v37 }
 0x3c6   : > { %2604 = vxpose.xlu1.b32.cont [6/16] (narrow) %v2524_v29, 32 }
 0x3ca   : > { %2605 = vxpose.xlu1.b32.cont [7/16] (narrow) %v2529_v18, 32 }
 0x3ce   : > { %2606 = vxpose.xlu1.b32.cont [8/16] (narrow) %v2532_v39, 32 }
 0x3da   : > { %v3098_v49 = vpop.f32.mrb[56].mxu1  ;;  %v2583_v50 = vpop.trf.xlu0 }
 0x3db   : > { %v2536_v51 = vpop.f32.mrb[57].mxu1  ;;  %v2631_v52 = vsub.f32 0.0, %v2583_v50  ;;  %v2545_v21 = vadd.f32 %v3098_v49, %v4607_v14 }
 0x3dc   : > { %v2537_v48 = vadd.f32 %v4607_v14, %v2536_v51  ;;  %v3099_v38 = vpop.f32.mrb[58].mxu1 }
 0x3dd   : > { %v2539_v53 = vpop.f32.mrb[59].mxu1  ;;  %v2639_v7 = vmul.f32 1.442695, %v2631_v52  ;;  %v2548_v31 = vadd.f32 %v3099_v38, %v4607_v14 }
 0x3de   : > { %2607 = vxpose.xlu1.b32.cont [9/16] (narrow) %v2537_v48, 32  ;;  %v2584_v57 = vpop.trf.xlu0  ;;  %v2540_v63 = vadd.f32 %v4607_v14, %v2539_v53 }
 0x3df   : > { %3693 = vpow2.f32 %v2639_v7  ;;  %v2633_v60 = vsub.f32 0.0, %v2584_v57 }
 0x3e1   : > { %v2643_v0 = vmul.f32 1.442695, %v2633_v60 }
 0x3e2   : > { %2608 = vxpose.xlu1.b32.cont [10/16] (narrow) %v2540_v63, 32  ;;  %v2585_v8 = vpop.trf.xlu0 }
 0x3e3   : > { %3695 = vpow2.f32 %v2643_v0  ;;  %v2635_v25 = vsub.f32 0.0, %v2585_v8 }
 0x3e5   : > { %v2647_v1 = vmul.f32 1.442695, %v2635_v25 }
 0x3e6   : > { %2609 = vxpose.xlu1.b32.cont [11/16] (narrow) %v2545_v21, 32  ;;  %v2586_v2 = vpop.trf.xlu0 }
 0x3e7   : > { %3697 = vpow2.f32 %v2647_v1  ;;  %v2637_v43 = vsub.f32 0.0, %v2586_v2 }
 0x3e9   : > { %v3694_v59 = vpop.eup %3693  ;;  %v2651_v61 = vmul.f32 1.442695, %v2637_v43 }
 0x3ea   : > { %2610 = vxpose.xlu1.b32.cont [12/16] (narrow) %v2548_v31, 32  ;;  %v2655_v3 = vadd.f32 1.0, %v3694_v59 }
 0x3eb   : > { %3699 = vpow2.f32 %v2651_v61 }
 0x3ec   : > { %3701 = vrcp.f32 %v2655_v3 }
 0x3ed   : > { %v3696_v5 = vpop.eup %3695 }
 0x3ee   : > { %v2657_v34 = vadd.f32 1.0, %v3696_v5 }
 0x3f0   : > { %3703 = vrcp.f32 %v2657_v34 }
 0x3f1   : > { %v3698_v10 = vpop.eup %3697 }
 0x3f2   : > { %v2659_v62 = vadd.f32 1.0, %v3698_v10 }
 0x3f4   : > { %3705 = vrcp.f32 %v2659_v62 }
 0x3f5   : > { %v3700_v12 = vpop.eup %3699 }
 0x3f6   : > { %v3702_v20 = vpop.eup %3701  ;;  %v3102_v27 = vpop.f32.mrb[60].mxu1  ;;  %v2661_v54 = vadd.f32 1.0, %v3700_v12 }
 0x3f7   : > { %v2552_v40 = vpop.f32.mrb[61].mxu1  ;;  %2671 = vst [vmem:[%s4641_s28] sm:$0xff] %v3702_v20  ;;  %v2561_v19 = vadd.f32 %v3102_v27, %v4607_v14 }
 0x3f8   : > { %v2553_v55 = vadd.f32 %v4607_v14, %v2552_v40  ;;  %v3103_v56 = vpop.f32.mrb[62].mxu1  ;;  %3707 = vrcp.f32 %v2661_v54 }
 0x3f9   : > { %v2555_v47 = vpop.f32.mrb[63].mxu1  ;;  %v2564_v44 = vadd.f32 %v3103_v56, %v4607_v14 }
 0x3fa   : > { %v3704_v58 = vpop.eup %3703  ;;  %2611 = vxpose.xlu1.b32.cont [13/16] (narrow) %v2553_v55, 32  ;;  %v2556_v9 = vadd.f32 %v4607_v14, %v2555_v47 }
 0x3fb   : > { %2673 = vst [vmem:[%s4641_s28 + $0x10] sm:$0xff] %v3704_v58 }
 0x3fe   : > { %v3706_v13 = vpop.eup %3705  ;;  %2612 = vxpose.xlu1.b32.cont [14/16] (narrow) %v2556_v9, 32 }
 0x3ff   : > { %2675 = vst [vmem:[%s4641_s28 + $0x20] sm:$0xff] %v3706_v13 }
 0x402   : > { %v3708_v16 = vpop.eup %3707  ;;  %2613 = vxpose.xlu1.b32.cont [15/16] (narrow) %v2561_v19, 32 }
 0x403   : > { %2677 = vst [vmem:[%s4641_s28 + $0x30] sm:$0xff] %v3708_v16 }
 0x406   : > { %2614 = vxpose.xlu1.b32.end [16/16] (narrow) %v2564_v44, 32 }
 0x44a   : > { %v2615_v45 = vpop.trf.xlu1 }
 0x44b   : > { %v2632_v46 = vsub.f32 0.0, %v2615_v45 }
 0x44d   : > { %v2641_v17 = vmul.f32 1.442695, %v2632_v46 }
 0x44e   : > { %v2616_v6 = vpop.trf.xlu1 }
 0x44f   : > { %3709 = vpow2.f32 %v2641_v17  ;;  %v2634_v41 = vsub.f32 0.0, %v2616_v6 }
 0x451   : > { %v2645_v42 = vmul.f32 1.442695, %v2634_v41 }
 0x452   : > { %v2617_v22 = vpop.trf.xlu1 }
 0x453   : > { %3711 = vpow2.f32 %v2645_v42  ;;  %v2636_v24 = vsub.f32 0.0, %v2617_v22 }
 0x455   : > { %v2649_v26 = vmul.f32 1.442695, %v2636_v24 }
 0x456   : > { %v2618_v23 = vpop.trf.xlu1 }
 0x457   : > { %3713 = vpow2.f32 %v2649_v26  ;;  %v2638_v32 = vsub.f32 0.0, %v2618_v23 }
 0x459   : > { %v3710_v33 = vpop.eup %3709  ;;  %v2653_v30 = vmul.f32 1.442695, %v2638_v32 }
 0x45a   : > { %v2656_v14 = vadd.f32 1.0, %v3710_v33 }
 0x45b   : > { %3715 = vpow2.f32 %v2653_v30 }
 0x45c   : > { %3717 = vrcp.f32 %v2656_v14 }
 0x45d   : > { %v3712_v28 = vpop.eup %3711 }
 0x45e   : > { %v2658_v4 = vadd.f32 1.0, %v3712_v28 }
 0x460   : > { %3719 = vrcp.f32 %v2658_v4 }
 0x461   : > { %v3714_v35 = vpop.eup %3713 }
 0x462   : > { %v2660_v11 = vadd.f32 1.0, %v3714_v35 }
 0x464   : > { %3721 = vrcp.f32 %v2660_v11 }
 0x465   : > { %v3716_v15 = vpop.eup %3715 }
 0x466   : > { %v3718_v36 = vpop.eup %3717  ;;  %v2662_v37 = vadd.f32 1.0, %v3716_v15 }
 0x467   : > { %2672 = vst [vmem:[%s4641_s28 + $0x8] sm:$0xff] %v3718_v36 }
 0x468   : > { %3723 = vrcp.f32 %v2662_v37 }
 0x46a   : > { %v3720_v29 = vpop.eup %3719 }
 0x46b   : > { %2674 = vst [vmem:[%s4641_s28 + $0x18] sm:$0xff] %v3720_v29 }
 0x46e   : > { %v3722_v18 = vpop.eup %3721 }
 0x46f   : > { %2676 = vst [vmem:[%s4641_s28 + $0x28] sm:$0xff] %v3722_v18 }
 0x472   : > { %v3724_v39 = vpop.eup %3723 }
 0x473   : > { %2678 = vst [vmem:[%s4641_s28 + $0x38] sm:$0xff] %v3724_v39 }
 0x474 PF: > { %s17_s24 = sadd.s32 1, %s3731_s24  }
 0x475   : > { %p14_p4 = scmp.ge.s32.totalorder %s17_s24, 4  }
 0x477   :  { %16 = sbr.rel (!%p14_p4) target bundleno = 1 (0x1), region = 80 }

</bundles_post_ra>
